<compile_context>
chip_gen: v6e
topology: v6e:2x2x1
jax: 0.10.0
libtpu: 0.0.40
codegen_flags: <defaults>
</compile_context>

<pallas_src>
import functools

import jax
import jax.numpy as jnp
from jax.experimental import pallas as pl
from jax.experimental.pallas import tpu as pltpu

DROPOUT_P = 0.1  # F.dropout default (training=True) -> dropout is active


def _flash_attn_kernel(q_ref, k_ref, bits_ref, o_ref, m_sc, l_sc, acc_sc,
                       *, scale, dropout_p):
    ki = pl.program_id(2)

    @pl.when(ki == 0)
    def _init():
        m_sc[...] = jnp.full(m_sc.shape, -jnp.inf, m_sc.dtype)
        l_sc[...] = jnp.zeros(l_sc.shape, l_sc.dtype)
        acc_sc[...] = jnp.zeros(acc_sc.shape, acc_sc.dtype)

    q = q_ref[...]                                     # (tq, D), input dtype
    k = k_ref[...]                                     # (tk, D), input dtype

    # Fold the softmax scale into the (tq, D) operand (cheaper than scaling
    # the (tq, tk) product) and contract on the MXU without an explicit .T.
    qs = q * jnp.asarray(scale, dtype=q.dtype)
    s = jax.lax.dot_general(
        qs, k,
        dimension_numbers=(((1,), (1,)), ((), ())),
        preferred_element_type=jnp.float32)            # (tq, tk) f32

    m_prev = m_sc[...]
    m_new = jnp.maximum(m_prev, jnp.max(s, axis=-1, keepdims=True))
    alpha = jnp.exp(m_prev - m_new)                    # (tq, 1)
    p = jnp.exp(s - m_new)                             # (tq, tk) f32

    # Softmax denominator uses the *unmasked* probabilities — dropout is
    # applied after softmax in the reference module.
    l_sc[...] = alpha * l_sc[...] + jnp.sum(p, axis=-1, keepdims=True)

    if dropout_p > 0.0:
        # Drop with probability dropout_p via an exact integer threshold.
        thr = jnp.uint32(min(int(dropout_p * 4294967296.0), 4294967295))
        keep = bits_ref[...] >= thr
        p = jnp.where(keep, p, 0.0)

    acc_sc[...] = alpha * acc_sc[...] + jnp.dot(
        p.astype(k.dtype), k, preferred_element_type=jnp.float32)
    m_sc[...] = m_new

    @pl.when(ki == pl.num_programs(2) - 1)
    def _finalize():
        # Fold the dropout 1/(1-p) rescale into the per-row normalization.
        inv_keep = 1.0 / (1.0 - dropout_p) if dropout_p > 0.0 else 1.0
        o_ref[...] = (acc_sc[...] * (inv_keep / l_sc[...])).astype(o_ref.dtype)


def model_forward(x, dropout_bits, inv_scale_factor=None, dropout_p=DROPOUT_P,
                  block_q=128, block_k=128):
    """x: (B, S, D); dropout_bits: (B, S, S) uint32 (deterministic mask source)."""
    B, S, D = x.shape
    if inv_scale_factor is None:
        inv_scale_factor = float(D) ** 0.5
    scale = 1.0 / float(inv_scale_factor)

    # Tile S; fall back to a single full-extent tile if S is not divisible.
    tq = block_q if (S % block_q == 0) else S
    tk = block_k if (S % block_k == 0) else S
    grid = (B, S // tq, S // tk)

    kernel = functools.partial(
        _flash_attn_kernel, scale=scale, dropout_p=float(dropout_p))

    return pl.pallas_call(
        kernel,
        out_shape=jax.ShapeDtypeStruct((B, S, D), x.dtype),
        grid=grid,
        in_specs=[
            pl.BlockSpec((None, tq, D), lambda b, qi, ki: (b, qi, 0)),    # Q tile
            pl.BlockSpec((None, tk, D), lambda b, qi, ki: (b, ki, 0)),    # K/V tile
            pl.BlockSpec((None, tq, tk), lambda b, qi, ki: (b, qi, ki)),  # dropout bits
        ],
        out_specs=pl.BlockSpec((None, tq, D), lambda b, qi, ki: (b, qi, 0)),
        scratch_shapes=[
            pltpu.VMEM((tq, 1), jnp.float32),   # running max m
            pltpu.VMEM((tq, 1), jnp.float32),   # running denom l
            pltpu.VMEM((tq, D), jnp.float32),   # output accumulator
        ],
        compiler_params=pltpu.CompilerParams(
            dimension_semantics=("parallel", "parallel", "arbitrary"),
            vmem_limit_bytes=64 * 1024 * 1024,
        ),
    )(x, x, dropout_bits)


def _reference(x, dropout_bits, inv_scale_factor, dropout_p):
    """Pure-JAX reference with the same deterministic dropout mask."""
    qk = jnp.einsum("bqd,bkd->bqk", x, x,
                    preferred_element_type=jnp.float32) / inv_scale_factor
    p = jax.nn.softmax(qk, axis=-1)
    if dropout_p > 0.0:
        thr = jnp.uint32(min(int(dropout_p * 4294967296.0), 4294967295))
        keep = dropout_bits >= thr
        p = jnp.where(keep, p / (1.0 - dropout_p), 0.0)
    return jnp.einsum("bqk,bkd->bqd", p, x).astype(x.dtype)


if __name__ == "__main__":
    key = jax.random.PRNGKey(0)
    kx, kb = jax.random.split(key)

    B, S, D = 2, 256, 128  # multi-tile grid (2, 2, 2); lane-dense D
    x = jax.random.normal(kx, (B, S, D), dtype=jnp.float32)
    dropout_bits = jax.random.bits(kb, (B, S, S), dtype=jnp.uint32)

    inv_scale_factor = float(D) ** 0.5

    # 1) Correctness without dropout (exact softmax-attention check).
    out_nd = model_forward(x, dropout_bits, inv_scale_factor, dropout_p=0.0)
    ref_nd = _reference(x, dropout_bits, inv_scale_factor, 0.0)
    jax.block_until_ready(out_nd)
    assert out_nd.shape == (B, S, D)
    assert jnp.allclose(out_nd, ref_nd, atol=2e-3, rtol=2e-3)

    # 2) Forward with dropout active (same deterministic mask as reference).
    out = model_forward(x, dropout_bits, inv_scale_factor, dropout_p=DROPOUT_P)
    ref = _reference(x, dropout_bits, inv_scale_factor, DROPOUT_P)
    jax.block_until_ready(out)
    assert out.shape == (B, S, D)
    assert jnp.all(jnp.isfinite(out))
    assert jnp.allclose(out, ref, atol=2e-3, rtol=2e-3)

    print("KERNEL_OK")
</pallas_src>

<mosaic_0001>
module attributes {stable_mosaic.version = 11 : i64} {
  func.func @_flash_attn_kernel(%arg0: i32, %arg1: i32, %arg2: i32, %arg3: memref<1x128x128xf32, #tpu.memory_space<vmem>>, %arg4: memref<1x128x128xf32, #tpu.memory_space<vmem>>, %arg5: memref<1x128x128xi32, #tpu.memory_space<vmem>>, %arg6: memref<1x128x128xf32, #tpu.memory_space<vmem>>, %arg7: memref<128x1xf32, #tpu.memory_space<vmem>>, %arg8: memref<128x1xf32, #tpu.memory_space<vmem>>, %arg9: memref<128x128xf32, #tpu.memory_space<vmem>>) attributes {dimension_semantics = [#tpu.dimension_semantics<parallel>, #tpu.dimension_semantics<parallel>, #tpu.dimension_semantics<arbitrary>], iteration_bounds = array<i64: 2, 2, 2>, scalar_prefetch = 0 : i64, scratch_operands = 3 : i64, tpu.core_type = #tpu.core_type<tc>, window_params = [{transform_indices = @transform_0, window_bounds = array<i64: 1, 128, 128>}, {transform_indices = @transform_1, window_bounds = array<i64: 1, 128, 128>}, {transform_indices = @transform_2, window_bounds = array<i64: 1, 128, 128>}, {transform_indices = @transform_3, window_bounds = array<i64: 1, 128, 128>}]} {
    %c0_i32 = arith.constant 0 : i32
    %0 = arith.cmpi eq, %arg2, %c0_i32 : i32
    %1 = arith.extui %0 : i1 to i32
    %c0_i32_0 = arith.constant 0 : i32
    %2 = arith.cmpi ne, %1, %c0_i32_0 : i32
    scf.if %2 {
      %cst_23 = arith.constant 0xFF800000 : f32
      %35 = vector.broadcast %cst_23 : f32 to vector<128x1xf32>
      %c0_24 = arith.constant 0 : index
      %c0_25 = arith.constant 0 : index
      %36 = vector.load %arg7[%c0_24, %c0_25] : memref<128x1xf32, #tpu.memory_space<vmem>>, vector<128x1xf32>
      tpu.vector_store %arg7[%c0_24, %c0_25], %35 {strides = array<i32>} : memref<128x1xf32, #tpu.memory_space<vmem>>, vector<128x1xf32>,
      %cst_26 = arith.constant 0.000000e+00 : f32
      %37 = vector.broadcast %cst_26 : f32 to vector<128x1xf32>
      %c0_27 = arith.constant 0 : index
      %c0_28 = arith.constant 0 : index
      %38 = vector.load %arg8[%c0_27, %c0_28] : memref<128x1xf32, #tpu.memory_space<vmem>>, vector<128x1xf32>
      tpu.vector_store %arg8[%c0_27, %c0_28], %37 {strides = array<i32>} : memref<128x1xf32, #tpu.memory_space<vmem>>, vector<128x1xf32>,
      %cst_29 = arith.constant 0.000000e+00 : f32
      %39 = vector.broadcast %cst_29 : f32 to vector<128x128xf32>
      %c0_30 = arith.constant 0 : index
      %c0_31 = arith.constant 0 : index
      %40 = vector.load %arg9[%c0_30, %c0_31] : memref<128x128xf32, #tpu.memory_space<vmem>>, vector<128x128xf32>
      tpu.vector_store %arg9[%c0_30, %c0_31], %39 {strides = array<i32>} : memref<128x128xf32, #tpu.memory_space<vmem>>, vector<128x128xf32>,
    } else {
    }
    %c0 = arith.constant 0 : index
    %c0_1 = arith.constant 0 : index
    %c0_2 = arith.constant 0 : index
    %3 = vector.load %arg3[%c0, %c0_1, %c0_2] : memref<1x128x128xf32, #tpu.memory_space<vmem>>, vector<1x128x128xf32>
    %4 = vector.shape_cast %3 : vector<1x128x128xf32> to vector<128x128xf32>
    %c0_3 = arith.constant 0 : index
    %c0_4 = arith.constant 0 : index
    %c0_5 = arith.constant 0 : index
    %5 = vector.load %arg4[%c0_3, %c0_4, %c0_5] : memref<1x128x128xf32, #tpu.memory_space<vmem>>, vector<1x128x128xf32>
    %6 = vector.shape_cast %5 : vector<1x128x128xf32> to vector<128x128xf32>
    %cst = arith.constant 0.0883883461 : f32
    %7 = vector.broadcast %cst : f32 to vector<128x128xf32>
    %8 = arith.mulf %4, %7 : vector<128x128xf32>
    %cst_6 = arith.constant dense<0.000000e+00> : vector<128x128xf32>
    %9 = tpu.matmul %8, %6, %cst_6 {dimension_numbers = #tpu.dot_dimension_numbers<[1], [1], [0], [0], [0, 0, 1, 0], [], []>} : vector<128x128xf32>, vector<128x128xf32>, vector<128x128xf32> -> vector<128x128xf32>
    %c0_7 = arith.constant 0 : index
    %c0_8 = arith.constant 0 : index
    %10 = vector.load %arg7[%c0_7, %c0_8] : memref<128x1xf32, #tpu.memory_space<vmem>>, vector<128x1xf32>
    %cst_9 = arith.constant dense<0xFF800000> : vector<128xf32>
    %11 = vector.multi_reduction <maximumf>, %9, %cst_9 [1] : vector<128x128xf32> to vector<128xf32>
    %12 = vector.shape_cast %11 : vector<128xf32> to vector<128x1xf32>
    %13 = arith.maximumf %10, %12 : vector<128x1xf32>
    %14 = arith.subf %10, %13 : vector<128x1xf32>
    %15 = math.exp %14 : vector<128x1xf32>
    %16 = vector.broadcast %13 : vector<128x1xf32> to vector<128x128xf32>
    %17 = arith.subf %9, %16 : vector<128x128xf32>
    %18 = math.exp %17 : vector<128x128xf32>
    %c0_10 = arith.constant 0 : index
    %c0_11 = arith.constant 0 : index
    %19 = vector.load %arg8[%c0_10, %c0_11] : memref<128x1xf32, #tpu.memory_space<vmem>>, vector<128x1xf32>
    %20 = arith.mulf %15, %19 : vector<128x1xf32>
    %cst_12 = arith.constant dense<0.000000e+00> : vector<128xf32>
    %21 = vector.multi_reduction <add>, %18, %cst_12 [1] : vector<128x128xf32> to vector<128xf32>
    %22 = vector.shape_cast %21 : vector<128xf32> to vector<128x1xf32>
    %23 = arith.addf %20, %22 : vector<128x1xf32>
    %c0_13 = arith.constant 0 : index
    %c0_14 = arith.constant 0 : index
    %24 = vector.load %arg8[%c0_13, %c0_14] : memref<128x1xf32, #tpu.memory_space<vmem>>, vector<128x1xf32>
    tpu.vector_store %arg8[%c0_13, %c0_14], %23 {strides = array<i32>} : memref<128x1xf32, #tpu.memory_space<vmem>>, vector<128x1xf32>,
    %c0_15 = arith.constant 0 : index
    %c0_16 = arith.constant 0 : index
    %25 = vector.load %arg9[%c0_15, %c0_16] : memref<128x128xf32, #tpu.memory_space<vmem>>, vector<128x128xf32>
    %26 = vector.broadcast %15 : vector<128x1xf32> to vector<128x128xf32>
    %27 = arith.mulf %26, %25 : vector<128x128xf32>
    %cst_17 = arith.constant dense<0.000000e+00> : vector<128x128xf32>
    %28 = tpu.matmul %18, %6, %cst_17 {dimension_numbers = #tpu.dot_dimension_numbers<[1], [0], [0], [1], [0, 0, 1, 1], [], []>} : vector<128x128xf32>, vector<128x128xf32>, vector<128x128xf32> -> vector<128x128xf32>
    %29 = arith.addf %27, %28 : vector<128x128xf32>
    %c0_18 = arith.constant 0 : index
    %c0_19 = arith.constant 0 : index
    %30 = vector.load %arg9[%c0_18, %c0_19] : memref<128x128xf32, #tpu.memory_space<vmem>>, vector<128x128xf32>
    tpu.vector_store %arg9[%c0_18, %c0_19], %29 {strides = array<i32>} : memref<128x128xf32, #tpu.memory_space<vmem>>, vector<128x128xf32>,
    %c0_20 = arith.constant 0 : index
    %c0_21 = arith.constant 0 : index
    %31 = vector.load %arg7[%c0_20, %c0_21] : memref<128x1xf32, #tpu.memory_space<vmem>>, vector<128x1xf32>
    tpu.vector_store %arg7[%c0_20, %c0_21], %13 {strides = array<i32>} : memref<128x1xf32, #tpu.memory_space<vmem>>, vector<128x1xf32>,
    %c1_i32 = arith.constant 1 : i32
    %32 = arith.cmpi eq, %arg2, %c1_i32 : i32
    %33 = arith.extui %32 : i1 to i32
    %c0_i32_22 = arith.constant 0 : i32
    %34 = arith.cmpi ne, %33, %c0_i32_22 : i32
    scf.if %34 {
      %c0_23 = arith.constant 0 : index
      %c0_24 = arith.constant 0 : index
      %35 = vector.load %arg9[%c0_23, %c0_24] : memref<128x128xf32, #tpu.memory_space<vmem>>, vector<128x128xf32>
      %c0_25 = arith.constant 0 : index
      %c0_26 = arith.constant 0 : index
      %36 = vector.load %arg8[%c0_25, %c0_26] : memref<128x1xf32, #tpu.memory_space<vmem>>, vector<128x1xf32>
      %cst_27 = arith.constant 1.000000e+00 : f32
      %37 = vector.broadcast %cst_27 : f32 to vector<128x1xf32>
      %38 = arith.divf %37, %36 : vector<128x1xf32>
      %39 = vector.broadcast %38 : vector<128x1xf32> to vector<128x128xf32>
      %40 = arith.mulf %35, %39 : vector<128x128xf32>
      %c0_28 = arith.constant 0 : index
      %c0_29 = arith.constant 0 : index
      %c0_30 = arith.constant 0 : index
      %41 = vector.load %arg6[%c0_28, %c0_29, %c0_30] : memref<1x128x128xf32, #tpu.memory_space<vmem>>, vector<1x128x128xf32>
      %42 = vector.shape_cast %41 : vector<1x128x128xf32> to vector<128x128xf32>
      %43 = vector.shape_cast %40 : vector<128x128xf32> to vector<1x128x128xf32>
      tpu.vector_store %arg6[%c0_28, %c0_29, %c0_30], %43 {strides = array<i32>} : memref<1x128x128xf32, #tpu.memory_space<vmem>>, vector<1x128x128xf32>,
    } else {
    }
    return
  }
  func.func @transform_0(%arg0: i32, %arg1: i32, %arg2: i32) -> (i32, i32, i32) {
    %c0_i32 = arith.constant 0 : i32
    %c0_i32_0 = arith.constant 0 : i32
    return %arg0, %arg1, %c0_i32 : i32, i32, i32
  }
  func.func @transform_1(%arg0: i32, %arg1: i32, %arg2: i32) -> (i32, i32, i32) {
    %c0_i32 = arith.constant 0 : i32
    %c0_i32_0 = arith.constant 0 : i32
    return %arg0, %arg2, %c0_i32 : i32, i32, i32
  }
  func.func @transform_2(%arg0: i32, %arg1: i32, %arg2: i32) -> (i32, i32, i32) {
    %c0_i32 = arith.constant 0 : i32
    return %arg0, %arg1, %arg2 : i32, i32, i32
  }
  func.func @transform_3(%arg0: i32, %arg1: i32, %arg2: i32) -> (i32, i32, i32) {
    %c0_i32 = arith.constant 0 : i32
    %c0_i32_0 = arith.constant 0 : i32
    return %arg0, %arg1, %c0_i32 : i32, i32, i32
  }
}

</mosaic_0001>

<bundles_post_ra>
// kernel: tpu_custom_call.1
= control target key start
LH: loop header
LB: loop body
LE: loop exit
PB: predicated region body
PF: predicated region fallthrough
CT: control target
= control target key end

     0   :  { %s3059_s0 = inlined_call_operand.hbm [shape: f32[2,256,128], index: 0, kind: input, shape index: {}]   ;;  %s3060_s1 = inlined_call_operand.hbm [shape: f32[2,256,128], index: 1, kind: input, shape index: {}]   ;;  %s3061_s2 = inlined_call_operand.hbm [shape: u32[2,256,256], index: 2, kind: input, shape index: {}]   ;;  %s3062_s3 = inlined_call_operand.hbm [shape: f32[2,256,128], index: 3, kind: output, shape index: {}]  }
   0x1   :  { %3090 = sst [smem:[#allocation32_spill]] %s3060_s1 }
   0x2   :  { %3091 = sst [smem:[#allocation33_spill]] %s3061_s2 }
   0x3   :  { %3092 = sst [smem:[#allocation34_spill]] %s3062_s3 }
   0x4   :  { %8 = vsyncpa [#allocation6], 0 }
   0x5   :  { %10 = vsyncpa [#allocation6 + $0x1], 0 }
   0x6   :  { %11 = vsyncpa [#allocation9], 0 }
   0x7   :  { %13 = vsyncpa [#allocation9 + $0x1], 0 }
   0x8   :  { %14 = vsyncpa [#allocation7], 0 }
   0x9   :  { %16 = vsyncpa [#allocation7 + $0x1], 0  ;;  %s2291_s12 = smov 0   ;;  %s2293_s13 = smov 0  }
   0xa   :  { %s2295_s14 = smov 0   ;;  %s2297_s15 = smov 0  }
   0xb   :  { %s2299_s16 = smov 0   ;;  %s2301_s17 = smov 0  }
   0xc   :  { %s2303_s18 = smov 0   ;;  %s2305_s19 = smov 0  }
   0xd   :  { %s2307_s20 = smov 0   ;;  %s2309_s21 = smov 0  }
   0xe   :  { %s2311_s22 = smov 0   ;;  %s2313_s23 = smov 0  }
   0xf   :  { %s2315_s24 = smov 0   ;;  %s2317_s25 = smov 0  }
  0x10   :  { %s2319_s26 = smov 0   ;;  %s2321_s27 = smov 0  }
  0x11 LB: > { %3093 = sst [smem:[#allocation16_spill]] %s2212_s16  ;;  %s2370_s28 = sadd.s32 4294967295, %s2256_s27   ;;  %s2256_s27 = sphi %s2321_s27, %s22_s27   ;;  %s2252_s26 = sphi %s2319_s26, %s3170_s26   ;;  %s2248_s25 = sphi %s2317_s25, %s3169_s25   ;;  %s2244_s24 = sphi %s2315_s24, %s3157_s24   ;;  %s2240_s23 = sphi %s2313_s23, %s3168_s23   ;;  %s2236_s22 = sphi %s2311_s22, %s3167_s22   ;;  %s2232_s21 = sphi %s2309_s21, %s3156_s21   ;;  %s2228_s20 = sphi %s2307_s20, %s3166_s20   ;;  %s2224_s19 = sphi %s2305_s19, %s3165_s19   ;;  %s2220_s18 = sphi %s2303_s18, %s3155_s18   ;;  %s2216_s17 = sphi %s2301_s17, %s3164_s17   ;;  %s2212_s16 = sphi %s2299_s16, %s3163_s16   ;;  %s2208_s15 = sphi %s2297_s15, %s3154_s15   ;;  %s2204_s14 = sphi %s2295_s14, %s3162_s14   ;;  %s2200_s13 = sphi %s2293_s13, %s3161_s13   ;;  %s2196_s12 = sphi %s2291_s12, %s3160_s12  }
  0x12   : > { %3094 = sst [smem:[#allocation17_spill]] %s2220_s18  ;;  %s34_s29 = sadd.s32 1, %s2244_s24 }
  0x13   : > { %3095 = sst [smem:[#allocation18_spill]] %s2224_s19  ;;  %p2373_p0 = scmp.ge.s32.totalorder %s34_s29, 2 }
  0x14   : > { %3096 = sst [smem:[#allocation19_spill]] %s2232_s21  ;;  %p3087_p1 = scmp.eq.s32.totalorder %s2256_s27, 0 }
  0x15   : > { %3097 = sst [smem:[#allocation20_spill]] %s2236_s22  ;;  %p3069_p2 = scmp.eq.s32.totalorder %s2370_s28, 0 }
  0x16   : > { %3098 = sst [smem:[#allocation21_spill]] %s2240_s23  ;;  %s3172_s29 = smov (%p2373_p0, %s34_s29), 0 }
  0x17   : > { %3099 = sst [smem:[#allocation22_spill]] %s2244_s24  ;;  %p85_p3 = scmp.ne.s32.totalorder %s2216_s17, %s2212_s16 }
  0x18   : > { %3101 = sst [smem:[#allocation23_spill]] %s3172_s29  ;;  %s2389_s6 = ssub.s32 %s2244_s24, %s3172_s29 }
  0x19   : > { %p91_p4 = scmp.ne.s32.totalorder %s2212_s16, %s2208_s15  ;;  %p2394_p5 = por %p85_p3, %p3087_p1 }
  0x1a   : > { %p3068_p7 = scmp.lt.s32.totalorder %s2256_s27, 8  ;;  %s3074_s9 = sshll.u32 %s2252_s26, 5 }
  0x1b   : > { %p2400_p6 = por %p91_p4, %p3069_p2  ;;  %s196_s10 = sand.u32 1, %s2256_s27  }
  0x1c   : > { %s198_s11 = sand.u32 1, %s2216_s17   ;;  %s1546_s4 = sshll.u32 %s2244_s24, 4 }
  0x1d   : > { %s3103_s8 = scalar_select %p2400_p6, 1, 0 }
  0x1e   : > { %s1545_s5 = sshll.u32 %s198_s11, 7  ;;  %s206_s15 = sadd.s32 %s1546_s4, %s3074_s9 }
  0x1f   : > { %3104 = sst [smem:[#allocation24_spill]] %s3103_s8  ;;  %s1548_s29 = sshll.u32 %s206_s15, 7 }
  0x20   : > { %s200_s3 = scalar_lea.vmem [#allocation8], %s1545_s5  ;;  %s3105_s1 = sld [smem:[#allocation32_spill]] }
  0x21   : > { %s209_s23 = sshll.u32 %s200_s3, 4  ;;  %p2418_p8 = pnand %p3068_p7, %p2394_p5  ;;  %s210_s23 = int_to_ptr.vmem [resolvable:$true] %s209_s23 }
  0x22   : > { %p1554_p9 = scmp.ge.s32.totalorder %s2256_s27, 1  ;;  %p242_p10 = scmp.lt.s32.totalorder %s2256_s27, 9 }
  0x23   : > { %s2424_s11 = scalar_lea.sflag [#allocation9], %s196_s10  ;;  %p2006_p11 = pneg %p2418_p8 }
  0x24   : > { %3107 = sst [smem:[#allocation25_spill]] %s2424_s11  ;;  %s2017_s4 = scalar_lea.vmem %s210_s23, 2048 }
  0x25   : > { %p2018_p12 = scmp.ne.s32.totalorder %s210_s23, %s2017_s4  ;;  %s2258_s3 = smov [#allocation8]  }
  0x26   : > { %s208_s16 = scalar_lea.hbm %s3105_s1, %s1548_s29  ;;  %s2022_s21 = sshll.u32 %s2258_s3, 4  ;;  %s2023_s21 = int_to_ptr.vmem [resolvable:$false] %s2022_s21 }
  0x27   : > { %p2020_p13 = pnand %p2018_p12, %p2006_p11  ;;  %s2024_s22 = scalar_lea.vmem %s2023_s21, 4096 }
  0x28   : > { %p2025_p4 = scmp.lt.s32.totalorder %s210_s23, %s2023_s21  ;;  %p2026_p5 = scmp.lt.s32.totalorder %s2024_s22, %s2017_s4 }
  0x29   : > { %p2021_p3 = pneg %p2020_p13 }
  0x2a   : > { %p2027_p7 = por %p2026_p5, %p2025_p4 }
  0x2c   : > { %p2028_p2 = pnand %p2027_p7, %p2021_p3 }
  0x2e   : > { %2031 = shalt.err (!%p2028_p2)
}
  0x2f   : > { %s3070_s29 = smov 128   ;;  %s3072_s5 = smov 8  }
  0x30   : > { %1757 = dma.hbm_to_vmem [thread:$0]  (!%p2418_p8), %s208_s16, 2048, %s210_s23, %s2424_s11, %s3070_s29, %s3070_s29, %s3072_s5  }
  0x31   : > { %p2438_p2 = pnand %p1554_p9, %p242_p10  ;;  %s1538_s10 = sadd.s32 4294967294, %s2256_s27  }
  0x32   : > { %s37_s15 = sadd.s32 1, %s2248_s25  ;;  %s50_s4 = sadd.s32 1, %s2228_s20 }
  0x33   : > { %s3108_s7 = scalar_select %p2438_p2, 1, 0 }
  0x34   : > { %s3174_s15 = smov (!%p2373_p0, %s37_s15), %s2248_s25  ;;  %p57_p7 = scmp.ne.s32.totalorder %s2228_s20, %s2224_s19 }
  0x35   : > { %3109 = sst [smem:[#allocation26_spill]] %s3108_s7  ;;  %p63_p11 = scmp.ne.s32.totalorder %s2224_s19, %s2220_s18 }
  0x36   : > { %p39_p12 = scmp.ge.s32.totalorder %s3174_s15, 2  ;;  %p147_p8 = scmp.eq.s32.totalorder %s2370_s28, 7 }
  0x37   : > { %p2455_p9 = por %p3087_p1, %p57_p7  ;;  %p3111_p10 = scmp.eq.s32.totalorder %s2370_s28, 0 }
  0x38   : > { %s3176_s15 = smov (%p39_p12, %s3174_s15), 0  ;;  %s3115_s30 = sadd.s32 1, %s2252_s26 }
  0x39   : > { %p2464_p13 = por %p3111_p10, %p63_p11  ;;  %3114 = sst [smem:[#allocation28_spill]] %s3176_s15 }
  0x3a   : > { %s3178_s30 = smov (!%p39_p12, %s3115_s30), %s2252_s26  ;;  %s46_s8 = ssub.s32 %s2248_s25, %s3176_s15 }
  0x3b   : > { %s3112_s23 = scalar_select %p2464_p13, 1, 0 }
  0x3c   : > { %p2475_p0 = por %p147_p8, %p57_p7  ;;  %p43_p3 = scmp.ge.s32.totalorder %s3178_s30, 2 }
  0x3d   : > { %3113 = sst [smem:[#allocation27_spill]] %s3112_s23  ;;  %p153_p4 = scmp.eq.s32.totalorder %s1538_s10, 7 }
  0x3e   : > { %s3116_s3 = scalar_select %p2475_p0, 1, 0 }
  0x3f   : > { %s173_s21 = sand.u32 1, %s2228_s20   ;;  %s1542_s22 = sshll.u32 %s2248_s25, 4 }
  0x40   : > { %3117 = sst [smem:[#allocation29_spill]] %s3116_s3  ;;  %s3180_s30 = smov (%p43_p3, %s3178_s30), 0 }
  0x41   : > { %3118 = sst [smem:[#allocation30_spill]] %s3180_s30  ;;  %p2486_p5 = por %p153_p4, %p63_p11 }
  0x42   : > { %s45_s5 = ssub.s32 %s2252_s26, %s3180_s30  ;;  %s1541_s9 = sshll.u32 %s173_s21, 7 }
  0x43   : > { %s3119_s29 = scalar_select %p2486_p5, 1, 0 }
  0x44   : > { %s47_s1 = sor.u32 %s46_s8, %s45_s5  ;;  %s75_s15 = sor.u32 %s2389_s6, %s45_s5 }
  0x45   : > { %3120 = sst [smem:[#allocation31_spill]] %s3119_s29  ;;  %p48_p7 = scmp.eq.s32.totalorder %s47_s1, 0 }
  0x46   : > { %p76_p12 = scmp.eq.s32.totalorder %s75_s15, 0  ;;  %s105_s3 = sor.u32 %s2389_s6, %s47_s1 }
  0x47   : > { %s2495_s10 = scalar_select %p48_p7, %s2228_s20, %s50_s4  }
  0x48   : > { %s3121_s23 = sadd.s32 1, %s2216_s17  ;;  %p2502_p8 = scmp.eq.s32.totalorder %s105_s3, 0 }
  0x49   : > { %s2500_s7 = scalar_select %p76_p12, %s2216_s17, %s3121_s23  }
  0x4a   : > { %s3123_s19 = sshll.u32 %s2252_s26, 5  ;;  %s177_s11 = scalar_lea.vmem [#allocation5], %s1541_s9 }
  0x4b   : > { %s183_s29 = sadd.s32 %s3123_s19, %s1542_s22  ;;  %s186_s2 = sshll.u32 %s177_s11, 4  ;;  %s187_s2 = int_to_ptr.vmem [resolvable:$true] %s186_s2 }
  0x4c   : > { %s1544_s30 = sshll.u32 %s183_s29, 7  ;;  %p3124_p11 = scmp.lt.s32.totalorder %s2256_s27, 8 }
  0x4d   : > { %s185_s5 = scalar_lea.hbm %s3059_s0, %s1544_s30  ;;  %s174_s6 = scalar_lea.sflag [#allocation6], %s173_s21 }
  0x4e   : > { %p2515_p10 = pnand %p3124_p11, %p2455_p9  ;;  %s2045_s15 = scalar_lea.vmem %s187_s2, 2048 }
  0x4f   : > { %p2046_p4 = scmp.ne.s32.totalorder %s187_s2, %s2045_s15  ;;  %s2261_s19 = smov [#allocation5]  }
  0x50   : > { %p2034_p3 = pneg %p2515_p10  ;;  %s2050_s9 = sshll.u32 %s2261_s19, 4  ;;  %s2051_s9 = int_to_ptr.vmem [resolvable:$false] %s2050_s9 }
  0x51   : > { %s2052_s24 = scalar_lea.vmem %s2051_s9, 4096  ;;  %p2053_p1 = scmp.lt.s32.totalorder %s187_s2, %s2051_s9 }
  0x52   : > { %p2048_p7 = pnand %p2046_p4, %p2034_p3  ;;  %p2054_p5 = scmp.lt.s32.totalorder %s2052_s24, %s2045_s15 }
  0x54   : > { %p2049_p12 = pneg %p2048_p7  ;;  %p2055_p0 = por %p2054_p5, %p2053_p1 }
  0x56   : > { %p2056_p6 = pnand %p2055_p0, %p2049_p12 }
  0x58   : > { %2059 = shalt.err (!%p2056_p6)
}
  0x59   : > { %s3126_s11 = smov 8   ;;  %s3127_s29 = smov 128  }
  0x5a   : > { %s3128_s4 = sld [smem:[#allocation22_spill]]  ;;  %s108_s16 = sadd.s32 1, %s2204_s14 }
  0x5b   : > { %1754 = dma.hbm_to_vmem [thread:$0]  (!%p2515_p10), %s185_s5, 2048, %s187_s2, %s174_s6, %s3127_s29, %s3127_s29, %s3126_s11  }
  0x5c   : > { %p115_p1 = scmp.ne.s32.totalorder %s2204_s14, %s2200_s13  ;;  %p3129_p6 = scmp.eq.s32.totalorder %s2256_s27, 0 }
  0x5d   : > { %s2532_s23 = scalar_select %p2502_p8, %s2204_s14, %s108_s16  }
  0x5e   : > { %p2536_p9 = por %p115_p1, %p3129_p6  ;;  %p121_p0 = scmp.ne.s32.totalorder %s2200_s13, %s2196_s12 }
  0x5f   : > { %s221_s3 = sand.u32 1, %s2204_s14   ;;  %s1566_s21 = sshll.u32 %s2248_s25, 5 }
  0x60   : > { %p3131_p5 = scmp.eq.s32.totalorder %s2370_s28, 0  ;;  %s1549_s2 = sshll.u32 %s221_s3, 7 }
  0x61   : > { %s229_s8 = sadd.s32 %s3128_s4, %s1566_s21  ;;  %s1552_s5 = sshll.u32 %s2252_s26, 6 }
  0x62   : > { %p2546_p11 = por %p121_p0, %p3131_p5  ;;  %s223_s18 = scalar_lea.vmem [#allocation10], %s1549_s2 }
  0x63   : > { %s234_s1 = sshll.u32 %s223_s18, 4  ;;  %s231_s6 = sadd.s32 %s1552_s5, %s229_s8  ;;  %s235_s1 = int_to_ptr.vmem [resolvable:$true] %s234_s1 }
  0x64   : > { %s1553_s15 = sshll.u32 %s231_s6, 7  ;;  %p3133_p8 = scmp.lt.s32.totalorder %s2256_s27, 8 }
  0x65   : > { %s3135_s24 = sld [smem:[#allocation33_spill]]  ;;  %s2073_s4 = scalar_lea.vmem %s235_s1, 2048 }
  0x66   : > { %p2556_p10 = pnand %p3133_p8, %p2536_p9  ;;  %p2074_p4 = scmp.ne.s32.totalorder %s235_s1, %s2073_s4 }
  0x67   : > { %s2262_s3 = smov [#allocation10]  }
  0x68   : > { %p2062_p3 = pneg %p2556_p10  ;;  %s2078_s21 = sshll.u32 %s2262_s3, 4  ;;  %s2079_s21 = int_to_ptr.vmem [resolvable:$false] %s2078_s21 }
  0x69   : > { %s2080_s30 = scalar_lea.vmem %s2079_s21, 4096  ;;  %p2081_p1 = scmp.lt.s32.totalorder %s235_s1, %s2079_s21 }
  0x6a   : > { %p2076_p7 = pnand %p2074_p4, %p2062_p3  ;;  %p2082_p6 = scmp.lt.s32.totalorder %s2080_s30, %s2073_s4 }
  0x6b   : > { %s233_s16 = scalar_lea.hbm %s3135_s24, %s1553_s15 }
  0x6c   : > { %p2077_p12 = pneg %p2076_p7  ;;  %p2083_p9 = por %p2082_p6, %p2081_p1 }
  0x6e   : > { %p2084_p0 = pnand %p2083_p9, %p2077_p12 }
  0x70   : > { %2087 = shalt.err (!%p2084_p0)
}
  0x71   : > { %s2263_s2 = smov 256   ;;  %s3136_s8 = sld [smem:[#allocation25_spill]] }
  0x72   : > { %s3138_s18 = sld [smem:[#allocation18_spill]] (!%p2438_p2) }
  0x73   : > { %246 = sbr.rel (%p2438_p2) target bundleno = 1159 (0x487), region = 32 }
  0x77   : > { %1760 = dma.hbm_to_vmem [thread:$0]  (!%p2556_p10), %s233_s16, 2048, %s235_s1, %s3136_s8, %s2263_s2, %s3127_s29, %s3126_s11  }
  0x78   : > { %s2573_s15 = sand.u32 1, %s3138_s18  }
  0x79   : > { %s1555_s12 = sshll.u32 %s2573_s15, 7  ;;  %s249_s9 = scalar_lea.sflag [#allocation6], %s2573_s15 }
  0x7a   : > { %s2577_s24 = scalar_lea.vmem [#allocation5], %s1555_s12 }
  0x7b   : > { %2179 = dma.done.wait (%p2464_p13), %s249_s9, 2048  }
  0x7c   : > { %2181 = vsyncadd (%p2464_p13), %s249_s9, 4294965248  ;;  %s3140_s11 = sld [smem:[#allocation16_spill]]  ;;  %s257_s1 = sand.u32 1, %s2370_s28  }
  0x7d   : > { %s3141_s29 = sld [smem:[#allocation24_spill]]  ;;  %s258_s4 = scalar_lea.sflag [#allocation9], %s257_s1 }
  0x82   : > { %s259_s19 = sand.u32 1, %s3140_s11  }
  0x83   : > { %s1556_s16 = sshll.u32 %s259_s19, 7  ;;  %p3142_p2 = scmp.ne.s32.totalorder %s3141_s29, 0 }
  0x84   : > { %s2585_s3 = scalar_lea.vmem [#allocation8], %s1556_s16 }
  0x85   : > { %2183 = dma.done.wait (%p3142_p2), %s258_s4, 2048  }
  0x86   : > { %2185 = vsyncadd (%p3142_p2), %s258_s4, 4294965248 }
  0x87   : > { %2187 = dma.done.wait (%p2546_p11), %s258_s4, 2048  }
  0x88   : > { %2189 = vsyncadd (%p2546_p11), %s258_s4, 4294965248  ;;  %s2595_s21 = scalar_lea.vmem [#allocation11], %s1555_s12  ;;  %s3143_s30 = sld [smem:[#allocation19_spill]] }
  0x8e   : > { %p1558_p13 = scmp.ne.s32.totalorder %s3143_s30, 0 }
  0x90   : > { %310 = sbr.rel (%p1558_p13) target bundleno = 174 (0xae), region = 48 }
  0x95   : > { %vm311_vm0 = vcmask 7168   ;;  %v2264_v0 = vmov -inf   ;;  %v2265_v1 = vmov 0.0  }
  0x96   : > { %312 = vst.msk [vmem:[#allocation2] sm:$0xff] %vm311_vm0, %v2264_v0  ;;  %313 = vst.msk [vmem:[#allocation2 + $0x8] sm:$0xff] %vm311_vm0, %v2264_v0 }
  0x97   : > { %314 = vst.msk [vmem:[#allocation2 + $0x10] sm:$0xff] %vm311_vm0, %v2264_v0  ;;  %315 = vst.msk [vmem:[#allocation2 + $0x18] sm:$0xff] %vm311_vm0, %v2264_v0 }
  0x98   : > { %316 = vst.msk [vmem:[#allocation2 + $0x20] sm:$0xff] %vm311_vm0, %v2264_v0  ;;  %317 = vst.msk [vmem:[#allocation2 + $0x28] sm:$0xff] %vm311_vm0, %v2264_v0 }
  0x99   : > { %318 = vst.msk [vmem:[#allocation2 + $0x30] sm:$0xff] %vm311_vm0, %v2264_v0  ;;  %319 = vst.msk [vmem:[#allocation2 + $0x38] sm:$0xff] %vm311_vm0, %v2264_v0 }
  0x9a   : > { %320 = vst.msk [vmem:[#allocation2 + $0x40] sm:$0xff] %vm311_vm0, %v2264_v0  ;;  %321 = vst.msk [vmem:[#allocation2 + $0x48] sm:$0xff] %vm311_vm0, %v2264_v0 }
  0x9b   : > { %322 = vst.msk [vmem:[#allocation2 + $0x50] sm:$0xff] %vm311_vm0, %v2264_v0  ;;  %323 = vst.msk [vmem:[#allocation2 + $0x58] sm:$0xff] %vm311_vm0, %v2264_v0 }
  0x9c   : > { %324 = vst.msk [vmem:[#allocation2 + $0x60] sm:$0xff] %vm311_vm0, %v2264_v0  ;;  %325 = vst.msk [vmem:[#allocation2 + $0x68] sm:$0xff] %vm311_vm0, %v2264_v0 }
  0x9d   : > { %326 = vst.msk [vmem:[#allocation2 + $0x70] sm:$0xff] %vm311_vm0, %v2264_v0  ;;  %327 = vst.msk [vmem:[#allocation2 + $0x78] sm:$0xff] %vm311_vm0, %v2264_v0 }
  0x9e   : > { %328 = vst.msk [vmem:[#allocation3] sm:$0xff] %vm311_vm0, %v2265_v1  ;;  %329 = vst.msk [vmem:[#allocation3 + $0x8] sm:$0xff] %vm311_vm0, %v2265_v1 }
  0x9f   : > { %330 = vst.msk [vmem:[#allocation3 + $0x10] sm:$0xff] %vm311_vm0, %v2265_v1  ;;  %331 = vst.msk [vmem:[#allocation3 + $0x18] sm:$0xff] %vm311_vm0, %v2265_v1 }
  0xa0   : > { %332 = vst.msk [vmem:[#allocation3 + $0x20] sm:$0xff] %vm311_vm0, %v2265_v1  ;;  %333 = vst.msk [vmem:[#allocation3 + $0x28] sm:$0xff] %vm311_vm0, %v2265_v1 }
  0xa1   : > { %334 = vst.msk [vmem:[#allocation3 + $0x30] sm:$0xff] %vm311_vm0, %v2265_v1  ;;  %335 = vst.msk [vmem:[#allocation3 + $0x38] sm:$0xff] %vm311_vm0, %v2265_v1 }
  0xa2   : > { %336 = vst.msk [vmem:[#allocation3 + $0x40] sm:$0xff] %vm311_vm0, %v2265_v1  ;;  %337 = vst.msk [vmem:[#allocation3 + $0x48] sm:$0xff] %vm311_vm0, %v2265_v1 }
  0xa3   : > { %338 = vst.msk [vmem:[#allocation3 + $0x50] sm:$0xff] %vm311_vm0, %v2265_v1  ;;  %339 = vst.msk [vmem:[#allocation3 + $0x58] sm:$0xff] %vm311_vm0, %v2265_v1 }
  0xa4   : > { %340 = vst.msk [vmem:[#allocation3 + $0x60] sm:$0xff] %vm311_vm0, %v2265_v1  ;;  %341 = vst.msk [vmem:[#allocation3 + $0x68] sm:$0xff] %vm311_vm0, %v2265_v1 }
  0xa5   : > { %342 = vst.msk [vmem:[#allocation3 + $0x70] sm:$0xff] %vm311_vm0, %v2265_v1  ;;  %343 = vst.msk [vmem:[#allocation3 + $0x78] sm:$0xff] %vm311_vm0, %v2265_v1 }
  0xa6   : > { %344 = vst [vmem:[#allocation4 + $0x30] sm:$0xff] %v2265_v1  ;;  %345 = vst [vmem:[#allocation4] sm:$0xff] %v2265_v1 }
  0xa7   : > { %346 = vst [vmem:[#allocation4 + $0x58] sm:$0xff] %v2265_v1  ;;  %347 = vst [vmem:[#allocation4 + $0x18] sm:$0xff] %v2265_v1 }
  0xa8   : > { %348 = vst [vmem:[#allocation4 + $0x50] sm:$0xff] %v2265_v1  ;;  %349 = vst [vmem:[#allocation4 + $0x68] sm:$0xff] %v2265_v1 }
  0xa9   : > { %350 = vst [vmem:[#allocation4 + $0x8] sm:$0xff] %v2265_v1  ;;  %351 = vst [vmem:[#allocation4 + $0x48] sm:$0xff] %v2265_v1 }
  0xaa   : > { %352 = vst [vmem:[#allocation4 + $0x40] sm:$0xff] %v2265_v1  ;;  %353 = vst [vmem:[#allocation4 + $0x20] sm:$0xff] %v2265_v1 }
  0xab   : > { %354 = vst [vmem:[#allocation4 + $0x10] sm:$0xff] %v2265_v1  ;;  %355 = vst [vmem:[#allocation4 + $0x38] sm:$0xff] %v2265_v1 }
  0xac   : > { %356 = vst [vmem:[#allocation4 + $0x60] sm:$0xff] %v2265_v1  ;;  %357 = vst [vmem:[#allocation4 + $0x70] sm:$0xff] %v2265_v1 }
  0xad   : > { %358 = vst [vmem:[#allocation4 + $0x78] sm:$0xff] %v2265_v1  ;;  %359 = vst [vmem:[#allocation4 + $0x28] sm:$0xff] %v2265_v1 }
  0xae PF: > { %v391_v2 = vld [vmem:[%s2585_s3 + $0x78] sm:$0xff]  ;;  %v390_v3 = vld [vmem:[%s2585_s3 + $0x70] sm:$0xff]  ;;  %v389_v4 = vld [vmem:[%s2585_s3 + $0x68] sm:$0xff]  ;;  %v2266_v58 = vmov 0   ;;  %vm873_vm1 = vcmask 7168   ;;  %s3144_s28 = sld [smem:[#allocation19_spill]] }
  0xaf   : > { %1631 = vmatprep.subr.mxu0 %v391_v2  ;;  %1687 = vmatprep.subr.mxu1 %v391_v2  ;;  %v360_v5 = vld [vmem:[%s2577_s24] sm:$0xff]  ;;  %v387_v8 = vld [vmem:[%s2585_s3 + $0x58] sm:$0xff]  ;;  %v386_v9 = vld [vmem:[%s2585_s3 + $0x50] sm:$0xff] }
  0xb0   : > { %1632 = vmatpush3.xpose.msra.mxu0 %v391_v2  ;;  %1688 = vmatpush3.msra.mxu1 %v391_v2  ;;  %v388_v6 = vld [vmem:[%s2585_s3 + $0x60] sm:$0xff]  ;;  %v392_v7 = vmul.f32 0.088388346, %v360_v5  ;;  %v385_v10 = vld [vmem:[%s2585_s3 + $0x48] sm:$0xff]  ;;  %v383_v12 = vld [vmem:[%s2585_s3 + $0x38] sm:$0xff] }
  0xb1   : > { %1633 = vmatprep.subr.mxu0 %v390_v3  ;;  %1689 = vmatprep.subr.mxu1 %v390_v3  ;;  %v384_v11 = vld [vmem:[%s2585_s3 + $0x40] sm:$0xff]  ;;  %v382_v13 = vld [vmem:[%s2585_s3 + $0x30] sm:$0xff]  ;;  %v381_v14 = vld [vmem:[%s2585_s3 + $0x28] sm:$0xff] }
  0xb2   : > { %1690 = vmatpush3.msra.mxu1 %v390_v3  ;;  %1663 = vmatprep.mubr.f32.mxu0 %v392_v7  ;;  %v380_v15 = vld [vmem:[%s2585_s3 + $0x20] sm:$0xff]  ;;  %v379_v16 = vld [vmem:[%s2585_s3 + $0x18] sm:$0xff]  ;;  %v378_v17 = vld [vmem:[%s2585_s3 + $0x10] sm:$0xff] }
  0xb3   : > { %1691 = vmatprep.subr.mxu1 %v389_v4  ;;  %v377_v18 = vld [vmem:[%s2585_s3 + $0x8] sm:$0xff]  ;;  %v376_v19 = vld [vmem:[%s2585_s3] sm:$0xff]  ;;  %v362_v21 = vld [vmem:[%s2577_s24 + $0x10] sm:$0xff]  ;;  %1904 = vset.pattern.permute.xlu0 %v2266_v58 }
  0xb4   : > { %1634 = vmatpush3.xpose.msra.mxu0 %v390_v3  ;;  %1692 = vmatpush3.msra.mxu1 %v389_v4  ;;  %v361_v20 = vld [vmem:[%s2577_s24 + $0x8] sm:$0xff]  ;;  %v394_v23 = vmul.f32 0.088388346, %v362_v21  ;;  %v363_v24 = vld [vmem:[%s2577_s24 + $0x18] sm:$0xff]  ;;  %v364_v25 = vld [vmem:[%s2577_s24 + $0x20] sm:$0xff]  ;;  %p1559_p5 = scmp.ne.s32.totalorder %s3144_s28, 1 }
  0xb5   : > { %1635 = vmatprep.subr.mxu0 %v389_v4  ;;  %1693 = vmatprep.subr.mxu1 %v388_v6  ;;  %v393_v22 = vmul.f32 0.088388346, %v361_v20  ;;  %v395_v26 = vmul.f32 0.088388346, %v363_v24  ;;  %v396_v27 = vmul.f32 0.088388346, %v364_v25 }
  0xb6   : > { %1694 = vmatpush3.msra.mxu1 %v388_v6  ;;  %v365_v28 = vld [vmem:[%s2577_s24 + $0x28] sm:$0xff]  ;;  %v366_v29 = vld [vmem:[%s2577_s24 + $0x30] sm:$0xff]  ;;  %v367_v32 = vld [vmem:[%s2577_s24 + $0x38] sm:$0xff]  ;;  %1905 = vset.pattern.permute.xlu1 %v2266_v58 }
  0xb7   : > { %1695 = vmatprep.subr.mxu1 %v387_v8  ;;  %v397_v30 = vmul.f32 0.088388346, %v365_v28  ;;  %v398_v31 = vmul.f32 0.088388346, %v366_v29  ;;  %v368_v33 = vld [vmem:[%s2577_s24 + $0x40] sm:$0xff]  ;;  %v369_v36 = vld [vmem:[%s2577_s24 + $0x48] sm:$0xff] }
  0xb8   : > { %1636 = vmatpush3.xpose.msra.mxu0 %v389_v4  ;;  %1696 = vmatpush3.msra.mxu1 %v387_v8  ;;  %v399_v34 = vmul.f32 0.088388346, %v367_v32  ;;  %v400_v35 = vmul.f32 0.088388346, %v368_v33  ;;  %v370_v37 = vld [vmem:[%s2577_s24 + $0x50] sm:$0xff]  ;;  %v371_v40 = vld [vmem:[%s2577_s24 + $0x58] sm:$0xff] }
  0xb9   : > { %1637 = vmatprep.subr.mxu0 %v388_v6  ;;  %1697 = vmatprep.subr.mxu1 %v386_v9  ;;  %v401_v38 = vmul.f32 0.088388346, %v369_v36  ;;  %v402_v39 = vmul.f32 0.088388346, %v370_v37  ;;  %v372_v41 = vld [vmem:[%s2577_s24 + $0x60] sm:$0xff]  ;;  %v373_v44 = vld [vmem:[%s2577_s24 + $0x68] sm:$0xff] }
  0xba   : > { %1698 = vmatpush3.msra.mxu1 %v386_v9  ;;  %v403_v42 = vmul.f32 0.088388346, %v371_v40  ;;  %v404_v43 = vmul.f32 0.088388346, %v372_v41  ;;  %v374_v45 = vld [vmem:[%s2577_s24 + $0x70] sm:$0xff]  ;;  %v375_v48 = vld [vmem:[%s2577_s24 + $0x78] sm:$0xff] }
  0xbb   : > { %1699 = vmatprep.subr.mxu1 %v385_v10  ;;  %v405_v46 = vmul.f32 0.088388346, %v373_v44  ;;  %v406_v47 = vmul.f32 0.088388346, %v374_v45  ;;  %v407_v49 = vmul.f32 0.088388346, %v375_v48 }
  0xbc   : > { %1638 = vmatpush3.xpose.msra.mxu0 %v388_v6  ;;  %1700 = vmatpush3.msra.mxu1 %v385_v10  ;;  %v553_v3 = vld [vmem:[#allocation2] sm:$0xff]  ;;  %v556_v5 = vld [vmem:[#allocation2 + $0x18] sm:$0xff]  ;;  %v2732_v20 = vld [vmem:[#allocation2 + $0x30] sm:$0xff] }
  0xbd   : > { %1639 = vmatprep.subr.mxu0 %v387_v8  ;;  %1701 = vmatprep.subr.mxu1 %v384_v11  ;;  %v562_v29 = vld [vmem:[#allocation2 + $0x48] sm:$0xff]  ;;  %v2749_v33 = vld [vmem:[#allocation2 + $0x50] sm:$0xff]  ;;  %v564_v37 = vld [vmem:[#allocation2 + $0x58] sm:$0xff] }
  0xbe   : > { %1702 = vmatpush3.msra.mxu1 %v384_v11  ;;  %v566_v45 = vld [vmem:[#allocation2 + $0x68] sm:$0xff]  ;;  %v2766_v58 = vld [vmem:[#allocation2 + $0x70] sm:$0xff] }
  0xbf   : > { %1703 = vmatprep.subr.mxu1 %v383_v12 }
  0xc0   : > { %1640 = vmatpush3.xpose.msra.mxu0 %v387_v8  ;;  %1704 = vmatpush3.msra.mxu1 %v383_v12  ;;  %v2710_v8 = vld [vmem:[#allocation2 + $0x8] sm:$0xff] }
  0xc1   : > { %1641 = vmatprep.subr.mxu0 %v386_v9  ;;  %1705 = vmatprep.subr.mxu1 %v382_v13 }
  0xc2   : > { %1706 = vmatpush3.msra.mxu1 %v382_v13 }
  0xc3   : > { %1707 = vmatprep.subr.mxu1 %v381_v14 }
  0xc4   : > { %1642 = vmatpush3.xpose.msra.mxu0 %v386_v9  ;;  %1708 = vmatpush3.msra.mxu1 %v381_v14 }
  0xc5   : > { %1643 = vmatprep.subr.mxu0 %v385_v10  ;;  %1709 = vmatprep.subr.mxu1 %v380_v15 }
  0xc6   : > { %1710 = vmatpush3.msra.mxu1 %v380_v15 }
  0xc7   : > { %1711 = vmatprep.subr.mxu1 %v379_v16 }
  0xc8   : > { %1644 = vmatpush3.xpose.msra.mxu0 %v385_v10  ;;  %1712 = vmatpush3.msra.mxu1 %v379_v16 }
  0xc9   : > { %1645 = vmatprep.subr.mxu0 %v384_v11  ;;  %1713 = vmatprep.subr.mxu1 %v378_v17 }
  0xca   : > { %1714 = vmatpush3.msra.mxu1 %v378_v17 }
  0xcb   : > { %1715 = vmatprep.subr.mxu1 %v377_v18 }
  0xcc   : > { %1646 = vmatpush3.xpose.msra.mxu0 %v384_v11  ;;  %1716 = vmatpush3.msra.mxu1 %v377_v18  ;;  %v2713_v11 = vld [vmem:[#allocation2 + $0x10] sm:$0xff] }
  0xcd   : > { %1647 = vmatprep.subr.mxu0 %v383_v12  ;;  %1717 = vmatprep.subr.mxu1 %v376_v19 }
  0xce   : > { %1718 = vmatpush3.msra.mxu1 %v376_v19 }
  0xd0   : > { %1648 = vmatpush3.xpose.msra.mxu0 %v383_v12 }
  0xd1   : > { %1649 = vmatprep.subr.mxu0 %v382_v13 }
  0xd4   : > { %1650 = vmatpush3.xpose.msra.mxu0 %v382_v13 }
  0xd5   : > { %1651 = vmatprep.subr.mxu0 %v381_v14 }
  0xd8   : > { %1652 = vmatpush3.xpose.msra.mxu0 %v381_v14  ;;  %v2719_v14 = vld [vmem:[#allocation2 + $0x20] sm:$0xff] }
  0xd9   : > { %1653 = vmatprep.subr.mxu0 %v380_v15 }
  0xdc   : > { %1654 = vmatpush3.xpose.msra.mxu0 %v380_v15 }
  0xdd   : > { %1655 = vmatprep.subr.mxu0 %v379_v16 }
  0xe0   : > { %1656 = vmatpush3.xpose.msra.mxu0 %v379_v16  ;;  %v558_v16 = vld [vmem:[#allocation2 + $0x28] sm:$0xff] }
  0xe1   : > { %1657 = vmatprep.subr.mxu0 %v378_v17 }
  0xe4   : > { %1658 = vmatpush3.xpose.msra.mxu0 %v378_v17 }
  0xe5   : > { %1659 = vmatprep.subr.mxu0 %v377_v18 }
  0xe8   : > { %1660 = vmatpush3.xpose.msra.mxu0 %v377_v18 }
  0xe9   : > { %1661 = vmatprep.subr.mxu0 %v376_v19 }
  0xec   : > { %1662 = vmatpush3.xpose.msra.mxu0 %v376_v19 }
  0xef   : > { %1664 = vmatmul.mubr.f32.vlgmr.msra.gmra.mxu0 %v393_v22  ;;  %v560_v22 = vld [vmem:[#allocation2 + $0x38] sm:$0xff] }
  0xf0   : > { %1666 = vmatprep.mubr.f32.mxu0 %v394_v23 }
  0xf3   : > { %1667 = vmatmul.mubr.f32.gmra.mxu0 %v395_v26  ;;  %v2740_v26 = vld [vmem:[#allocation2 + $0x40] sm:$0xff] }
  0xf4   : > { %1669 = vmatprep.mubr.f32.mxu0 %v396_v27 }
  0xf7   : > { %1670 = vmatmul.mubr.f32.gmra.mxu0 %v397_v30 }
  0xf8   : > { %1672 = vmatprep.mubr.f32.mxu0 %v398_v31 }
  0xfb   : > { %1673 = vmatmul.mubr.f32.gmra.mxu0 %v399_v34 }
  0xfc   : > { %1675 = vmatprep.mubr.f32.mxu0 %v400_v35 }
  0xff   : > { %1676 = vmatmul.mubr.f32.gmra.mxu0 %v401_v38 }
 0x100   : > { %1678 = vmatprep.mubr.f32.mxu0 %v402_v39 }
 0x103   : > { %1679 = vmatmul.mubr.f32.gmra.mxu0 %v403_v42  ;;  %v2757_v42 = vld [vmem:[#allocation2 + $0x60] sm:$0xff] }
 0x104   : > { %1681 = vmatprep.mubr.f32.mxu0 %v404_v43 }
 0x107   : > { %1682 = vmatmul.mubr.f32.gmra.mxu0 %v405_v46 }
 0x108   : > { %1684 = vmatprep.mubr.f32.mxu0 %v406_v47 }
 0x10b   : > { %1685 = vmatmul.mubr.f32.gmra.mxu0 %v407_v49 }
 0x1af   : > { %v2662_v50 = vpop.f32.mrf.mxu0 }
 0x1b1   : > { %v2664_v51 = vpop.f32.mrf.mxu0 }
 0x1b2   : > { %569 = vmax.xlane.f32.xlu0 %v2664_v51 }
 0x1b3   : > { %v2667_v52 = vpop.f32.mrf.mxu0 }
 0x1b4   : > { %575 = vmax.xlane.f32.xlu1 %v2667_v52 }
 0x1b5   : > { %v2670_v53 = vpop.f32.mrf.mxu0 }
 0x1b6   : > { %571 = vmax.xlane.f32.xlu0 %v2662_v50 }
 0x1b7   : > { %v2673_v54 = vpop.f32.mrf.mxu0 }
 0x1b8   : > { %573 = vmax.xlane.f32.xlu1 %v2670_v53 }
 0x1b9   : > { %v2676_v55 = vpop.f32.mrf.mxu0 }
 0x1ba   : > { %577 = vmax.xlane.f32.xlu0 %v2676_v55 }
 0x1bb   : > { %v2679_v56 = vpop.f32.mrf.mxu0 }
 0x1bc   : > { %579 = vmax.xlane.f32.xlu1 %v2673_v54 }
 0x1bd   : > { %v2682_v57 = vpop.f32.mrf.mxu0 }
 0x1be   : > { %581 = vmax.xlane.f32.xlu0 %v2682_v57 }
 0x1bf   : > { %v2685_v59 = vpop.f32.mrf.mxu0 }
 0x1c0   : > { %583 = vmax.xlane.f32.xlu1 %v2679_v56 }
 0x1c1   : > { %v2688_v60 = vpop.f32.mrf.mxu0 }
 0x1c2   : > { %585 = vmax.xlane.f32.xlu0 %v2688_v60 }
 0x1c3   : > { %v2691_v61 = vpop.f32.mrf.mxu0 }
 0x1c4   : > { %587 = vmax.xlane.f32.xlu1 %v2685_v59 }
 0x1c5   : > { %v2694_v62 = vpop.f32.mrf.mxu0 }
 0x1c6   : > { %589 = vmax.xlane.f32.xlu0 %v2694_v62 }
 0x1c7   : > { %v2697_v63 = vpop.f32.mrf.mxu0 }
 0x1c8   : > { %591 = vmax.xlane.f32.xlu1 %v2691_v61 }
 0x1c9   : > { %v2700_v0 = vpop.f32.mrf.mxu0 }
 0x1ca   : > { %593 = vmax.xlane.f32.xlu0 %v2700_v0 }
 0x1cb   : > { %v2703_v1 = vpop.f32.mrf.mxu0 }
 0x1cc   : > { %595 = vmax.xlane.f32.xlu1 %v2697_v63 }
 0x1cd   : > { %v2706_v2 = vpop.f32.mrf.mxu0 }
 0x1ce   : > { %597 = vmax.xlane.f32.xlu0 %v2706_v2 }
 0x1d0   : > { %599 = vmax.xlane.f32.xlu1 %v2703_v1 }
 0x23b   : > { %v570_v4 = vpop.xlane.xlu0 %569 }
 0x23c   : > { %v601_v6 = vmax.f32 %v553_v3, %v570_v4 }
 0x23d   : > { %v576_v7 = vpop.xlane.xlu1 %575 }
 0x23e   : > { %1179 = vst.msk [vmem:[#allocation2] sm:$0xff] %vm873_vm1, %v601_v6  ;;  %v604_v9 = vmax.f32 %v556_v5, %v576_v7  ;;  %667 = vperm.xlu0 %1904, %v601_v6   ;;  %v617_v27 = vsub.f32 %v553_v3, %v601_v6 }
 0x23f   : > { %v572_v10 = vpop.xlane.xlu0 %571 }
 0x240   : > { %1182 = vst.msk [vmem:[#allocation2 + $0x18] sm:$0xff] %vm873_vm1, %v604_v9  ;;  %v2717_v12 = vmax.f32 %v2710_v8, %v572_v10  ;;  %v633_v34 = vmul.f32 1.442695, %v617_v27  ;;  %v620_v35 = vsub.f32 %v556_v5, %v604_v9  ;;  %v2770_v5 = vld [vmem:[#allocation2 + $0x78] sm:$0xff] }
 0x241   : > { %v574_v13 = vpop.xlane.xlu1 %573 }
 0x242   : > { %1180 = vst.msk [vmem:[#allocation2 + $0x8] sm:$0xff] %vm873_vm1, %v2717_v12  ;;  %v2724_v15 = vmax.f32 %v2713_v11, %v574_v13  ;;  %672 = vperm.xlu1 %1905, %v2717_v12   ;;  %1906 = vpow2.f32 %v633_v34  ;;  %v639_v43 = vmul.f32 1.442695, %v620_v35  ;;  %v618_v7 = vsub.f32 %v2710_v8, %v2717_v12 }
 0x243   : > { %v578_v17 = vpop.xlane.xlu0 %577 }
 0x244   : > { %1181 = vst.msk [vmem:[#allocation2 + $0x10] sm:$0xff] %vm873_vm1, %v2724_v15  ;;  %v2730_v18 = vmax.f32 %v2719_v14, %v578_v17  ;;  %1908 = vpow2.f32 %v639_v43  ;;  %v635_v8 = vmul.f32 1.442695, %v618_v7  ;;  %v619_v12 = vsub.f32 %v2713_v11, %v2724_v15 }
 0x245   : > { %v580_v19 = vpop.xlane.xlu1 %579 }
 0x246   : > { %v606_v21 = vmax.f32 %v558_v16, %v580_v19  ;;  %682 = vperm.xlu1 %1905, %v604_v9   ;;  %1183 = vst.msk [vmem:[#allocation2 + $0x20] sm:$0xff] %vm873_vm1, %v2730_v18  ;;  %v637_v27 = vmul.f32 1.442695, %v619_v12  ;;  %v621_v11 = vsub.f32 %v2719_v14, %v2730_v18 }
 0x247   : > { %v582_v23 = vpop.xlane.xlu0 %581 }
 0x248   : > { %1184 = vst.msk [vmem:[#allocation2 + $0x28] sm:$0xff] %vm873_vm1, %v606_v21  ;;  %v2738_v24 = vmax.f32 %v2732_v20, %v582_v23  ;;  %v622_v40 = vsub.f32 %v558_v16, %v606_v21 }
 0x249   : > { %v584_v25 = vpop.xlane.xlu1 %583 }
 0x24a   : > { %v608_v28 = vmax.f32 %v560_v22, %v584_v25  ;;  %677 = vperm.xlu1 %1905, %v2724_v15   ;;  %1185 = vst.msk [vmem:[#allocation2 + $0x30] sm:$0xff] %vm873_vm1, %v2738_v24  ;;  %v643_v48 = vmul.f32 1.442695, %v622_v40 }
 0x24b   : > { %v586_v30 = vpop.xlane.xlu0 %585 }
 0x24c   : > { %1186 = vst.msk [vmem:[#allocation2 + $0x38] sm:$0xff] %vm873_vm1, %v608_v28  ;;  %v2747_v31 = vmax.f32 %v2740_v26, %v586_v30  ;;  %v624_v3 = vsub.f32 %v560_v22, %v608_v28  ;;  %1910 = vpow2.f32 %v643_v48  ;;  %v641_v30 = vmul.f32 1.442695, %v621_v11 }
 0x24d   : > { %v588_v32 = vpop.xlane.xlu1 %587 }
 0x24e   : > { %v610_v36 = vmax.f32 %v562_v29, %v588_v32  ;;  %692 = vperm.xlu1 %1905, %v606_v21   ;;  %1187 = vst.msk [vmem:[#allocation2 + $0x40] sm:$0xff] %vm873_vm1, %v2747_v31  ;;  %v647_v13 = vmul.f32 1.442695, %v624_v3  ;;  %v623_v32 = vsub.f32 %v2732_v20, %v2738_v24  ;;  %v625_v35 = vsub.f32 %v2740_v26, %v2747_v31 }
 0x24f   : > { %v590_v38 = vpop.xlane.xlu0 %589  ;;  %v2794_v25 = vpop.eup %1906 }
 0x250   : > { %1188 = vst.msk [vmem:[#allocation2 + $0x48] sm:$0xff] %vm873_vm1, %v610_v36  ;;  %712 = vperm.xlu0 %1904, %v610_v36   ;;  %v2755_v39 = vmax.f32 %v2749_v33, %v590_v38  ;;  %v626_v16 = vsub.f32 %v562_v29, %v610_v36  ;;  %1912 = vpow2.f32 %v647_v13  ;;  %v649_v20 = vmul.f32 1.442695, %v625_v35 }
 0x251   : > { %v592_v41 = vpop.xlane.xlu1 %591  ;;  %1914 = vpow2.f32 %v635_v8  ;;  %v2800_v29 = vpop.eup %1908 }
 0x252   : > { %v612_v44 = vmax.f32 %v564_v37, %v592_v41  ;;  %687 = vperm.xlu1 %1905, %v2730_v18   ;;  %1189 = vst.msk [vmem:[#allocation2 + $0x50] sm:$0xff] %vm873_vm1, %v2755_v39  ;;  %v651_v22 = vmul.f32 1.442695, %v626_v16  ;;  %v645_v18 = vmul.f32 1.442695, %v623_v32 }
 0x253   : > { %v594_v46 = vpop.xlane.xlu0 %593 }
 0x254   : > { %1190 = vst.msk [vmem:[#allocation2 + $0x58] sm:$0xff] %vm873_vm1, %v612_v44  ;;  %722 = vperm.xlu0 %1904, %v612_v44   ;;  %v2764_v47 = vmax.f32 %v2757_v42, %v594_v46  ;;  %v628_v23 = vsub.f32 %v564_v37, %v612_v44  ;;  %1916 = vpow2.f32 %v651_v22 }
 0x255   : > { %v596_v49 = vpop.xlane.xlu1 %595  ;;  %1918 = vpow2.f32 %v637_v27 }
 0x256   : > { %v614_v4 = vmax.f32 %v566_v45, %v596_v49  ;;  %702 = vperm.xlu1 %1905, %v608_v28   ;;  %1191 = vst.msk [vmem:[#allocation2 + $0x60] sm:$0xff] %vm873_vm1, %v2764_v47  ;;  %v655_v15 = vmul.f32 1.442695, %v628_v23 }
 0x257   : > { %v598_v6 = vpop.xlane.xlu0 %597 }
 0x258   : > { %1192 = vst.msk [vmem:[#allocation2 + $0x68] sm:$0xff] %vm873_vm1, %v614_v4  ;;  %732 = vperm.xlu0 %1904, %v614_v4   ;;  %v2776_v9 = vmax.f32 %v2766_v58, %v598_v6  ;;  %v630_v28 = vsub.f32 %v566_v45, %v614_v4  ;;  %1920 = vpow2.f32 %v655_v15 }
 0x259   : > { %v600_v10 = vpop.xlane.xlu1 %599  ;;  %v2805_v34 = vpop.eup %1910  ;;  %1922 = vpow2.f32 %v641_v30 }
 0x25a   : > { %v2779_v17 = vmax.f32 %v2770_v5, %v600_v10  ;;  %697 = vperm.xlu1 %1905, %v2738_v24   ;;  %v631_v19 = vsub.f32 %v2766_v58, %v2776_v9  ;;  %1193 = vst.msk [vmem:[#allocation2 + $0x70] sm:$0xff] %vm873_vm1, %v2776_v9  ;;  %v659_v14 = vmul.f32 1.442695, %v630_v28  ;;  %v627_v24 = vsub.f32 %v2749_v33, %v2755_v39 }
 0x25c   : > { %v632_v21 = vsub.f32 %v2770_v5, %v2779_v17  ;;  %1194 = vst.msk [vmem:[#allocation2 + $0x78] sm:$0xff] %vm873_vm1, %v2779_v17  ;;  %742 = vperm.xlu0 %1904, %v2779_v17   ;;  %1924 = vpow2.f32 %v659_v14  ;;  %v653_v26 = vmul.f32 1.442695, %v627_v24 }
 0x25d   : > { %v2812_v36 = vpop.eup %1912  ;;  %1926 = vpow2.f32 %v645_v18 }
 0x25e   : > { %707 = vperm.xlu1 %1905, %v2747_v31   ;;  %v2817_v37 = vpop.eup %1914  ;;  %1928 = vpow2.f32 %v649_v20  ;;  %v629_v31 = vsub.f32 %v2757_v42, %v2764_v47 }
 0x25f   : > { %1930 = vpow2.f32 %v653_v26 }
 0x260   : > { %908 = vperm.xlu0 %1904, %v2794_v25  }
 0x261   : > { %v2820_v38 = vpop.eup %1916 }
 0x262   : > { %717 = vperm.xlu1 %1905, %v2755_v39   ;;  %v2825_v40 = vpop.eup %1918  ;;  %v657_v39 = vmul.f32 1.442695, %v629_v31 }
 0x264   : > { %923 = vperm.xlu0 %1904, %v2800_v29   ;;  %1932 = vpow2.f32 %v657_v39 }
 0x265   : > { %v2828_v33 = vpop.eup %1920 }
 0x266   : > { %727 = vperm.xlu1 %1905, %v2764_v47   ;;  %v2831_v41 = vpop.eup %1922 }
 0x268   : > { %933 = vperm.xlu0 %1904, %v2805_v34  }
 0x269   : > { %v2834_v43 = vpop.eup %1924 }
 0x26a   : > { %737 = vperm.xlu1 %1905, %v2776_v9   ;;  %v2837_v42 = vpop.eup %1926 }
 0x26b   : > { %v2840_v44 = vpop.eup %1928 }
 0x26c   : > { %943 = vperm.xlu0 %1904, %v2812_v36   ;;  %v2843_v45 = vpop.eup %1930 }
 0x26e   : > { %913 = vperm.xlu1 %1905, %v2817_v37  }
 0x270   : > { %953 = vperm.xlu0 %1904, %v2820_v38  }
 0x271   : > { %v2846_v46 = vpop.eup %1932 }
 0x272   : > { %918 = vperm.xlu1 %1905, %v2825_v40  }
 0x274   : > { %963 = vperm.xlu0 %1904, %v2828_v33  }
 0x276   : > { %928 = vperm.xlu1 %1905, %v2831_v41  }
 0x278   : > { %973 = vperm.xlu0 %1904, %v2834_v43  }
 0x27a   : > { %938 = vperm.xlu1 %1905, %v2837_v42  }
 0x27e   : > { %948 = vperm.xlu1 %1905, %v2840_v44  }
 0x282   : > { %958 = vperm.xlu1 %1905, %v2843_v45  }
 0x286   : > { %968 = vperm.xlu1 %1905, %v2846_v46  }
 0x2b9   : > { %v668_v47 = vpop.permute.xlu0 %667 }
 0x2ba   : > { %v745_v48 = vsub.f32 %v2664_v51, %v668_v47 }
 0x2bc   : > { %v761_v49 = vmul.f32 1.442695, %v745_v48 }
 0x2bd   : > { %v673_v3 = vpop.permute.xlu1 %672 }
 0x2be   : > { %1934 = vpow2.f32 %v761_v49  ;;  %v746_v4 = vsub.f32 %v2662_v50, %v673_v3 }
 0x2c0   : > { %v763_v6 = vmul.f32 1.442695, %v746_v4 }
 0x2c1   : > { %v683_v7 = vpop.permute.xlu1 %682 }
 0x2c2   : > { %1936 = vpow2.f32 %v763_v6  ;;  %v748_v10 = vsub.f32 %v2667_v52, %v683_v7 }
 0x2c4   : > { %v767_v13 = vmul.f32 1.442695, %v748_v10 }
 0x2c5   : > { %v678_v16 = vpop.permute.xlu1 %677 }
 0x2c6   : > { %1938 = vpow2.f32 %v767_v13  ;;  %v747_v8 = vsub.f32 %v2670_v53, %v678_v16 }
 0x2c8   : > { %v765_v12 = vmul.f32 1.442695, %v747_v8 }
 0x2c9   : > { %v693_v22 = vpop.permute.xlu1 %692 }
 0x2ca   : > { %1940 = vpow2.f32 %v765_v12  ;;  %v750_v51 = vsub.f32 %v2673_v54, %v693_v22 }
 0x2cb   : > { %v1935_v23 = vpop.eup %1934  ;;  %v713_v27 = vpop.permute.xlu0 %712 }
 0x2cc   : > { %v771_v11 = vmul.f32 1.442695, %v750_v51  ;;  %825 = vadd.xlane.f32.xlu1 %v1935_v23  ;;  %1719 = vmatprep.mubr.f32.mxu1 %v1935_v23  ;;  %v754_v54 = vsub.f32 %v2685_v59, %v713_v27 }
 0x2cd   : > { %v688_v50 = vpop.permute.xlu1 %687 }
 0x2ce   : > { %1942 = vpow2.f32 %v771_v11  ;;  %v749_v15 = vsub.f32 %v2676_v55, %v688_v50  ;;  %v779_v26 = vmul.f32 1.442695, %v754_v54 }
 0x2cf   : > { %v1937_v52 = vpop.eup %1936  ;;  %v723_v30 = vpop.permute.xlu0 %722 }
 0x2d0   : > { %v769_v28 = vmul.f32 1.442695, %v749_v15  ;;  %827 = vadd.xlane.f32.xlu0 %v1937_v52  ;;  %1720 = vmatmul.mubr.f32.vlgmr.msra.gmra.mxu1 %v1937_v52  ;;  %v756_v31 = vsub.f32 %v2691_v61, %v723_v30  ;;  %v661_v52 = vmul.f32 1.442695, %v631_v19  ;;  %v663_v30 = vmul.f32 1.442695, %v632_v21 }
 0x2d1   : > { %v703_v53 = vpop.permute.xlu1 %702 }
 0x2d2   : > { %1944 = vpow2.f32 %v769_v28  ;;  %v752_v32 = vsub.f32 %v2679_v56, %v703_v53  ;;  %v783_v48 = vmul.f32 1.442695, %v756_v31 }
 0x2d3   : > { %v1939_v14 = vpop.eup %1938  ;;  %v733_v20 = vpop.permute.xlu0 %732 }
 0x2d4   : > { %v775_v18 = vmul.f32 1.442695, %v752_v32  ;;  %831 = vadd.xlane.f32.xlu1 %v1939_v14  ;;  %v758_v49 = vsub.f32 %v2697_v63, %v733_v20 }
 0x2d5   : > { %v698_v35 = vpop.permute.xlu1 %697 }
 0x2d6   : > { %1946 = vpow2.f32 %v775_v18  ;;  %v751_v24 = vsub.f32 %v2682_v57, %v698_v35  ;;  %v787_v7 = vmul.f32 1.442695, %v758_v49 }
 0x2d7   : > { %v1941_v55 = vpop.eup %1940  ;;  %v743_v3 = vpop.permute.xlu0 %742 }
 0x2d8   : > { %v773_v39 = vmul.f32 1.442695, %v751_v24  ;;  %829 = vadd.xlane.f32.xlu0 %v1941_v55  ;;  %1722 = vmatprep.mubr.f32.mxu1 %v1941_v55  ;;  %v760_v10 = vsub.f32 %v2703_v1, %v743_v3  ;;  %v796_v3 = vld [vmem:[#allocation3 + $0x18] sm:$0xff] }
 0x2d9   : > { %v708_v47 = vpop.permute.xlu1 %707  ;;  %1723 = vmatmul.mubr.f32.gmra.mxu1 %v1939_v14 }
 0x2da   : > { %1948 = vpow2.f32 %v773_v39  ;;  %v753_v56 = vsub.f32 %v2688_v60, %v708_v47  ;;  %v791_v8 = vmul.f32 1.442695, %v760_v10 }
 0x2db   : > { %v1943_v59 = vpop.eup %1942  ;;  %1950 = vpow2.f32 %v779_v26  ;;  %v2879_v19 = vpop.permute.xlu0 %908  ;;  %v793_v26 = vld [vmem:[#allocation3] sm:$0xff] }
 0x2dc   : > { %v777_v4 = vmul.f32 1.442695, %v753_v56  ;;  %835 = vadd.xlane.f32.xlu1 %v1943_v59  ;;  %v809_v31 = vmul.f32 %v2794_v25, %v793_v26  ;;  %v794_v56 = vld [vmem:[#allocation3 + $0x8] sm:$0xff]  ;;  %v803_v26 = vld [vmem:[#allocation3 + $0x50] sm:$0xff] }
 0x2dd   : > { %v718_v57 = vpop.permute.xlu1 %717 }
 0x2de   : > { %1952 = vpow2.f32 %v777_v4  ;;  %v755_v61 = vsub.f32 %v2694_v62, %v718_v57  ;;  %v812_v57 = vmul.f32 %v2800_v29, %v796_v3 }
 0x2df   : > { %v1945_v6 = vpop.eup %1944  ;;  %1954 = vpow2.f32 %v783_v48  ;;  %v2883_v14 = vpop.permute.xlu0 %923  ;;  %v810_v48 = vmul.f32 %v2817_v37, %v794_v56  ;;  %v819_v56 = vmul.f32 %v2843_v45, %v803_v26  ;;  %v807_v45 = vld [vmem:[#allocation3 + $0x70] sm:$0xff]  ;;  %v898_v26 = vld [vmem:[#allocation4 + $0x40] sm:$0xff] }
 0x2e0   : > { %v781_v13 = vmul.f32 1.442695, %v755_v61  ;;  %833 = vadd.xlane.f32.xlu0 %v1945_v6  ;;  %1725 = vmatprep.mubr.f32.mxu1 %v1945_v6  ;;  %v795_v6 = vld [vmem:[#allocation3 + $0x10] sm:$0xff] }
 0x2e1   : > { %v728_v60 = vpop.permute.xlu1 %727  ;;  %1726 = vmatmul.mubr.f32.gmra.mxu1 %v1943_v59  ;;  %v811_v25 = vmul.f32 %v2825_v40, %v795_v6 }
 0x2e2   : > { %1956 = vpow2.f32 %v781_v13  ;;  %v757_v63 = vsub.f32 %v2700_v0, %v728_v60  ;;  %v798_v13 = vld [vmem:[#allocation3 + $0x28] sm:$0xff] }
 0x2e3   : > { %v1947_v16 = vpop.eup %1946  ;;  %1958 = vpow2.f32 %v787_v7  ;;  %v2887_v5 = vpop.permute.xlu0 %933  ;;  %v814_v37 = vmul.f32 %v2805_v34, %v798_v13 }
 0x2e4   : > { %v785_v12 = vmul.f32 1.442695, %v757_v63  ;;  %839 = vadd.xlane.f32.xlu1 %v1947_v16 }
 0x2e5   : > { %v738_v22 = vpop.permute.xlu1 %737 }
 0x2e6   : > { %1960 = vpow2.f32 %v785_v12  ;;  %v759_v62 = vsub.f32 %v2706_v2, %v738_v22  ;;  %v800_v22 = vld [vmem:[#allocation3 + $0x38] sm:$0xff] }
 0x2e7   : > { %v1949_v51 = vpop.eup %1948  ;;  %1962 = vpow2.f32 %v791_v8  ;;  %v2891_v21 = vpop.permute.xlu0 %943  ;;  %v816_v40 = vmul.f32 %v2812_v36, %v800_v22  ;;  %v893_v22 = vld [vmem:[#allocation4 + $0x18] sm:$0xff] }
 0x2e8   : > { %v1951_v1 = vpop.eup %1950  ;;  %v789_v23 = vmul.f32 1.442695, %v759_v62  ;;  %837 = vadd.xlane.f32.xlu0 %v1949_v51  ;;  %1728 = vmatprep.mubr.f32.mxu1 %v1949_v51 }
 0x2e9   : > { %843 = vadd.xlane.f32.xlu1 %v1951_v1  ;;  %1729 = vmatmul.mubr.f32.gmra.mxu1 %v1947_v16  ;;  %v2877_v9 = vpop.permute.xlu1 %913  ;;  %v797_v16 = vld [vmem:[#allocation3 + $0x20] sm:$0xff] }
 0x2ea   : > { %1964 = vpow2.f32 %v789_v23  ;;  %v813_v29 = vmul.f32 %v2831_v41, %v797_v16 }
 0x2eb   : > { %v1953_v27 = vpop.eup %1952  ;;  %1966 = vpow2.f32 %v661_v52  ;;  %v2895_v35 = vpop.permute.xlu0 %953 }
 0x2ec   : > { %v1955_v0 = vpop.eup %1954  ;;  %841 = vadd.xlane.f32.xlu0 %v1953_v27  ;;  %1731 = vmatprep.mubr.f32.mxu1 %v1953_v27  ;;  %1968 = vpow2.f32 %v663_v30  ;;  %v802_v27 = vld [vmem:[#allocation3 + $0x48] sm:$0xff] }
 0x2ed   : > { %847 = vadd.xlane.f32.xlu1 %v1955_v0  ;;  %1732 = vmatmul.mubr.f32.gmra.mxu1 %v1951_v1  ;;  %v2881_v32 = vpop.permute.xlu1 %918  ;;  %v799_v1 = vld [vmem:[#allocation3 + $0x30] sm:$0xff] }
 0x2ee   : > { %v815_v34 = vmul.f32 %v2837_v42, %v799_v1 }
 0x2ef   : > { %v1957_v11 = vpop.eup %1956  ;;  %v2899_v24 = vpop.permute.xlu0 %963 }
 0x2f0   : > { %v1959_v50 = vpop.eup %1958  ;;  %845 = vadd.xlane.f32.xlu0 %v1957_v11  ;;  %1734 = vmatprep.mubr.f32.mxu1 %v1957_v11 }
 0x2f1   : > { %851 = vadd.xlane.f32.xlu1 %v1959_v50  ;;  %1735 = vmatmul.mubr.f32.gmra.mxu1 %v1955_v0  ;;  %v2885_v54 = vpop.permute.xlu1 %928  ;;  %v818_v0 = vmul.f32 %v2820_v38, %v802_v27 }
 0x2f3   : > { %v1961_v2 = vpop.eup %1960  ;;  %v2904_v39 = vpop.permute.xlu0 %973 }
 0x2f4   : > { %v1963_v15 = vpop.eup %1962  ;;  %849 = vadd.xlane.f32.xlu0 %v1961_v2  ;;  %1737 = vmatprep.mubr.f32.mxu1 %v1961_v2 }
 0x2f5   : > { %855 = vadd.xlane.f32.xlu1 %v1963_v15  ;;  %1738 = vmatmul.mubr.f32.gmra.mxu1 %v1959_v50  ;;  %v2889_v17 = vpop.permute.xlu1 %938  ;;  %v801_v50 = vld [vmem:[#allocation3 + $0x40] sm:$0xff] }
 0x2f6   : > { %v817_v36 = vmul.f32 %v2840_v44, %v801_v50  ;;  %v805_v44 = vld [vmem:[#allocation3 + $0x60] sm:$0xff] }
 0x2f7   : > { %v1965_v28 = vpop.eup %1964 }
 0x2f8   : > { %853 = vadd.xlane.f32.xlu0 %v1965_v28  ;;  %1740 = vmatprep.mubr.f32.mxu1 %v1965_v28  ;;  %v2871_v53 = vpop.eup %1966 }
 0x2f9   : > { %1741 = vmatmul.mubr.f32.gmra.mxu1 %v1963_v15  ;;  %v2874_v58 = vpop.eup %1968  ;;  %v2893_v18 = vpop.permute.xlu1 %948  ;;  %v804_v15 = vld [vmem:[#allocation3 + $0x58] sm:$0xff] }
 0x2fa   : > { %v820_v28 = vmul.f32 %v2828_v33, %v804_v15  ;;  %v896_v15 = vld [vmem:[#allocation4 + $0x8] sm:$0xff] }
 0x2fd   : > { %v2897_v20 = vpop.permute.xlu1 %958 }
 0x301   : > { %v2901_v55 = vpop.permute.xlu1 %968 }
 0x306   : > { %978 = vperm.xlu1 %1905, %v2871_v53  }
 0x30e   : > { %983 = vperm.xlu0 %1904, %v2874_v58  }
 0x355   : > { %v826_v47 = vpop.xlane.xlu1 %825 }
 0x356   : > { %v857_v59 = vadd.f32 %v826_v47, %v809_v31  ;;  %v806_v47 = vld [vmem:[#allocation3 + $0x68] sm:$0xff] }
 0x358   : > { %874 = vst.msk [vmem:[#allocation3] sm:$0xff] %vm873_vm1, %v857_v59  ;;  %v822_v59 = vmul.f32 %v2834_v43, %v806_v47  ;;  %v823_v43 = vmul.f32 %v2871_v53, %v807_v45  ;;  %v892_v53 = vld [vmem:[#allocation4 + $0x58] sm:$0xff] }
 0x359   : > { %v828_v49 = vpop.xlane.xlu0 %827 }
 0x35a   : > { %v858_v4 = vadd.f32 %v828_v49, %v810_v48 }
 0x35c   : > { %875 = vst.msk [vmem:[#allocation3 + $0x8] sm:$0xff] %vm873_vm1, %v858_v4  ;;  %v808_v4 = vld [vmem:[#allocation3 + $0x78] sm:$0xff] }
 0x35d   : > { %v832_v61 = vpop.xlane.xlu1 %831 }
 0x35e   : > { %v860_v7 = vadd.f32 %v832_v61, %v812_v57  ;;  %v821_v57 = vmul.f32 %v2846_v46, %v805_v44  ;;  %v824_v61 = vmul.f32 %v2874_v58, %v808_v4  ;;  %v891_v46 = vld [vmem:[#allocation4] sm:$0xff] }
 0x35f   : > { %v902_v4 = vld [vmem:[#allocation4 + $0x60] sm:$0xff] }
 0x360   : > { %877 = vst.msk [vmem:[#allocation3 + $0x18] sm:$0xff] %vm873_vm1, %v860_v7 }
 0x361   : > { %v830_v10 = vpop.xlane.xlu0 %829 }
 0x362   : > { %v859_v60 = vadd.f32 %v830_v10, %v811_v25 }
 0x364   : > { %876 = vst.msk [vmem:[#allocation3 + $0x10] sm:$0xff] %vm873_vm1, %v859_v60 }
 0x365   : > { %v836_v63 = vpop.xlane.xlu1 %835 }
 0x366   : > { %v862_v8 = vadd.f32 %v836_v63, %v814_v37  ;;  %v890_v37 = vld [vmem:[#allocation4 + $0x30] sm:$0xff]  ;;  %v987_v63 = vmul.f32 %v2877_v9, %v891_v46  ;;  %v895_v9 = vld [vmem:[#allocation4 + $0x68] sm:$0xff] }
 0x367   : > { %v986_v16 = vmul.f32 %v2879_v19, %v890_v37  ;;  %v991_v19 = vmul.f32 %v2887_v5, %v895_v9 }
 0x368   : > { %879 = vst.msk [vmem:[#allocation3 + $0x28] sm:$0xff] %vm873_vm1, %v862_v8 }
 0x369   : > { %v834_v12 = vpop.xlane.xlu0 %833 }
 0x36a   : > { %v861_v62 = vadd.f32 %v834_v12, %v813_v29 }
 0x36c   : > { %878 = vst.msk [vmem:[#allocation3 + $0x20] sm:$0xff] %vm873_vm1, %v861_v62  ;;  %v989_v62 = vmul.f32 %v2883_v14, %v893_v22  ;;  %v897_v14 = vld [vmem:[#allocation4 + $0x48] sm:$0xff] }
 0x36d   : > { %v840_v51 = vpop.xlane.xlu1 %839 }
 0x36e   : > { %v864_v23 = vadd.f32 %v840_v51, %v816_v40  ;;  %v988_v51 = vmul.f32 %v2881_v32, %v892_v53  ;;  %v993_v32 = vmul.f32 %v2891_v21, %v897_v14 }
 0x370   : > { %881 = vst.msk [vmem:[#allocation3 + $0x38] sm:$0xff] %vm873_vm1, %v864_v23 }
 0x371   : > { %v838_v11 = vpop.xlane.xlu0 %837 }
 0x372   : > { %v844_v41 = vpop.xlane.xlu1 %843  ;;  %v863_v2 = vadd.f32 %v838_v11, %v815_v34  ;;  %v894_v34 = vld [vmem:[#allocation4 + $0x50] sm:$0xff] }
 0x373   : > { %v866_v52 = vadd.f32 %v844_v41, %v818_v0  ;;  %v990_v11 = vmul.f32 %v2885_v54, %v894_v34 }
 0x374   : > { %880 = vst.msk [vmem:[#allocation3 + $0x30] sm:$0xff] %vm873_vm1, %v863_v2 }
 0x375   : > { %883 = vst.msk [vmem:[#allocation3 + $0x48] sm:$0xff] %vm873_vm1, %v866_v52  ;;  %v842_v30 = vpop.xlane.xlu0 %841  ;;  %v899_v52 = vld [vmem:[#allocation4 + $0x20] sm:$0xff] }
 0x376   : > { %v848_v31 = vpop.xlane.xlu1 %847  ;;  %v865_v42 = vadd.f32 %v842_v30, %v817_v36  ;;  %v995_v5 = vmul.f32 %v2895_v35, %v899_v52 }
 0x377   : > { %v868_v38 = vadd.f32 %v848_v31, %v820_v28  ;;  %v992_v28 = vmul.f32 %v2889_v17, %v896_v15  ;;  %v903_v17 = vld [vmem:[#allocation4 + $0x70] sm:$0xff] }
 0x378   : > { %882 = vst.msk [vmem:[#allocation3 + $0x40] sm:$0xff] %vm873_vm1, %v865_v42  ;;  %v901_v42 = vld [vmem:[#allocation4 + $0x38] sm:$0xff] }
 0x379   : > { %885 = vst.msk [vmem:[#allocation3 + $0x58] sm:$0xff] %vm873_vm1, %v868_v38  ;;  %v846_v48 = vpop.xlane.xlu0 %845  ;;  %v994_v38 = vmul.f32 %v2893_v18, %v898_v26  ;;  %v997_v21 = vmul.f32 %v2899_v24, %v901_v42 }
 0x37a   : > { %v852_v49 = vpop.xlane.xlu1 %851  ;;  %v867_v3 = vadd.f32 %v846_v48, %v819_v56 }
 0x37b   : > { %v870_v33 = vadd.f32 %v852_v49, %v822_v59  ;;  %v900_v59 = vld [vmem:[#allocation4 + $0x10] sm:$0xff] }
 0x37c   : > { %884 = vst.msk [vmem:[#allocation3 + $0x50] sm:$0xff] %vm873_vm1, %v867_v3  ;;  %v996_v3 = vmul.f32 %v2897_v20, %v900_v59 }
 0x37d   : > { %887 = vst.msk [vmem:[#allocation3 + $0x68] sm:$0xff] %vm873_vm1, %v870_v33  ;;  %v850_v6 = vpop.xlane.xlu0 %849 }
 0x37e   : > { %v856_v7 = vpop.xlane.xlu1 %855  ;;  %v869_v25 = vadd.f32 %v850_v6, %v821_v57  ;;  %v999_v57 = vmul.f32 %v2904_v39, %v903_v17 }
 0x37f   : > { %v872_v10 = vadd.f32 %v856_v7, %v824_v61  ;;  %v905_v61 = vld [vmem:[#allocation4 + $0x28] sm:$0xff]  ;;  %v998_v7 = vmul.f32 %v2901_v55, %v902_v4 }
 0x380   : > { %886 = vst.msk [vmem:[#allocation3 + $0x60] sm:$0xff] %vm873_vm1, %v869_v25  ;;  %v904_v25 = vld [vmem:[#allocation4 + $0x78] sm:$0xff] }
 0x381   : > { %889 = vst.msk [vmem:[#allocation3 + $0x78] sm:$0xff] %vm873_vm1, %v872_v10  ;;  %v854_v13 = vpop.xlane.xlu0 %853 }
 0x382   : > { %v871_v60 = vadd.f32 %v854_v13, %v823_v43  ;;  %v979_v10 = vpop.permute.xlu1 %978 }
 0x383   : > { %v1000_v46 = vmul.f32 %v979_v10, %v904_v25 }
 0x384   : > { %888 = vst.msk [vmem:[#allocation3 + $0x70] sm:$0xff] %vm873_vm1, %v871_v60 }
 0x389   : > { %v984_v6 = vpop.permute.xlu0 %983 }
 0x38a   : > { %v1001_v13 = vmul.f32 %v984_v6, %v905_v61 }
 0x390   : > { %v1721_v58 = vpop.f32.mrf.mxu1 }
 0x391   : > { %v1148_v8 = vadd.f32 %v1721_v58, %v987_v63 }
 0x392   : > { %v1068_v29 = vpop.f32.mrf.mxu1 }
 0x393   : > { %1164 = vst [vmem:[#allocation4] sm:$0xff] %v1148_v8  ;;  %v1147_v12 = vadd.f32 %v1068_v29, %v986_v16 }
 0x395   : > { %1163 = vst [vmem:[#allocation4 + $0x30] sm:$0xff] %v1147_v12 }
 0x399   : > { %v1724_v40 = vpop.f32.mrf.mxu1 }
 0x39a   : > { %v1150_v1 = vadd.f32 %v1724_v40, %v989_v62 }
 0x39b   : > { %v1078_v23 = vpop.f32.mrf.mxu1 }
 0x39c   : > { %1166 = vst [vmem:[#allocation4 + $0x18] sm:$0xff] %v1150_v1  ;;  %v1149_v27 = vadd.f32 %v1078_v23, %v988_v51 }
 0x39e   : > { %1165 = vst [vmem:[#allocation4 + $0x58] sm:$0xff] %v1149_v27 }
 0x3a1   : > { %v1727_v0 = vpop.f32.mrf.mxu1 }
 0x3a2   : > { %v1152_v50 = vadd.f32 %v1727_v0, %v991_v19 }
 0x3a3   : > { %v1088_v41 = vpop.f32.mrf.mxu1 }
 0x3a4   : > { %1168 = vst [vmem:[#allocation4 + $0x68] sm:$0xff] %v1152_v50  ;;  %v1151_v2 = vadd.f32 %v1088_v41, %v990_v11 }
 0x3a6   : > { %1167 = vst [vmem:[#allocation4 + $0x50] sm:$0xff] %v1151_v2 }
 0x3a9   : > { %v1730_v36 = vpop.f32.mrf.mxu1 }
 0x3aa   : > { %v1154_v30 = vadd.f32 %v1730_v36, %v993_v32 }
 0x3ab   : > { %v1098_v31 = vpop.f32.mrf.mxu1 }
 0x3ac   : > { %1170 = vst [vmem:[#allocation4 + $0x48] sm:$0xff] %v1154_v30  ;;  %v1153_v54 = vadd.f32 %v1098_v31, %v992_v28 }
 0x3ad   : > { %v1733_v47 = vpop.f32.mrf.mxu1 }
 0x3ae   : > { %1169 = vst [vmem:[#allocation4 + $0x8] sm:$0xff] %v1153_v54  ;;  %v1156_v56 = vadd.f32 %v1733_v47, %v995_v5 }
 0x3af   : > { %v1108_v48 = vpop.f32.mrf.mxu1 }
 0x3b0   : > { %1172 = vst [vmem:[#allocation4 + $0x20] sm:$0xff] %v1156_v56  ;;  %v1155_v44 = vadd.f32 %v1108_v48, %v994_v38 }
 0x3b1   : > { %v1736_v49 = vpop.f32.mrf.mxu1 }
 0x3b2   : > { %1171 = vst [vmem:[#allocation4 + $0x40] sm:$0xff] %v1155_v44  ;;  %v1158_v35 = vadd.f32 %v1736_v49, %v997_v21 }
 0x3b3   : > { %v1118_v33 = vpop.f32.mrf.mxu1 }
 0x3b4   : > { %1174 = vst [vmem:[#allocation4 + $0x38] sm:$0xff] %v1158_v35  ;;  %v1157_v18 = vadd.f32 %v1118_v33, %v996_v3 }
 0x3b5   : > { %v1739_v45 = vpop.f32.mrf.mxu1 }
 0x3b6   : > { %1173 = vst [vmem:[#allocation4 + $0x10] sm:$0xff] %v1157_v18  ;;  %v1160_v24 = vadd.f32 %v1739_v45, %v999_v57 }
 0x3b7   : > { %v1128_v43 = vpop.f32.mrf.mxu1 }
 0x3b8   : > { %1176 = vst [vmem:[#allocation4 + $0x70] sm:$0xff] %v1160_v24  ;;  %v1159_v20 = vadd.f32 %v1128_v43, %v998_v7 }
 0x3b9   : > { %v1742_v60 = vpop.f32.mrf.mxu1 }
 0x3ba   : > { %1175 = vst [vmem:[#allocation4 + $0x60] sm:$0xff] %v1159_v20  ;;  %v1162_v37 = vadd.f32 %v1742_v60, %v1001_v13  ;;  %1198 = sbr.rel (%p1559_p5) target bundleno = 1130 (0x46a), region = 52 }
 0x3bb   : > { %v1138_v39 = vpop.f32.mrf.mxu1 }
 0x3bc   : > { %1178 = vst [vmem:[#allocation4 + $0x28] sm:$0xff] %v1162_v37  ;;  %v1161_v63 = vadd.f32 %v1138_v39, %v1000_v46 }
 0x3be   : > { %1177 = vst [vmem:[#allocation4 + $0x78] sm:$0xff] %v1161_v63 }
 0x3bf   : > { %v1217_v55 = vld [vmem:[#allocation3 + $0x10] sm:$0xff]  ;;  %v1215_v58 = vld [vmem:[#allocation3] sm:$0xff]  ;;  %v1218_v16 = vld [vmem:[#allocation3 + $0x18] sm:$0xff]  ;;  %v2267_v8 = vmov 0  }
 0x3c0   : > { %1971 = vset.pattern.permute.xlu1 %v2267_v8  ;;  %1970 = vset.pattern.permute.xlu0 %v2267_v8  ;;  %1972 = vrcp.f32 %v1217_v55  ;;  %v1216_v29 = vld [vmem:[#allocation3 + $0x8] sm:$0xff]  ;;  %v1219_v22 = vld [vmem:[#allocation3 + $0x20] sm:$0xff]  ;;  %v1222_v53 = vld [vmem:[#allocation3 + $0x38] sm:$0xff] }
 0x3c1   : > { %1974 = vrcp.f32 %v1215_v58  ;;  %v1220_v12 = vld [vmem:[#allocation3 + $0x28] sm:$0xff]  ;;  %v1221_v62 = vld [vmem:[#allocation3 + $0x30] sm:$0xff]  ;;  %v1223_v51 = vld [vmem:[#allocation3 + $0x40] sm:$0xff] }
 0x3c2   : > { %1976 = vrcp.f32 %v1218_v16  ;;  %v1224_v40 = vld [vmem:[#allocation3 + $0x48] sm:$0xff]  ;;  %v1226_v9 = vld [vmem:[#allocation3 + $0x58] sm:$0xff]  ;;  %v1225_v19 = vld [vmem:[#allocation3 + $0x50] sm:$0xff] }
 0x3c3   : > { %1978 = vrcp.f32 %v1216_v29  ;;  %v1228_v11 = vld [vmem:[#allocation3 + $0x68] sm:$0xff]  ;;  %v1227_v41 = vld [vmem:[#allocation3 + $0x60] sm:$0xff]  ;;  %v1230_v14 = vld [vmem:[#allocation3 + $0x78] sm:$0xff] }
 0x3c4   : > { %1980 = vrcp.f32 %v1220_v12  ;;  %v1229_v32 = vld [vmem:[#allocation3 + $0x70] sm:$0xff]  ;;  %v1201_v42 = vld [vmem:[#allocation4 + $0x58] sm:$0xff]  ;;  %v1200_v44 = vld [vmem:[#allocation4] sm:$0xff] }
 0x3c5   : > { %1982 = vrcp.f32 %v1219_v22  ;;  %v1199_v47 = vld [vmem:[#allocation4 + $0x30] sm:$0xff]  ;;  %v1202_v21 = vld [vmem:[#allocation4 + $0x18] sm:$0xff]  ;;  %v1204_v4 = vld [vmem:[#allocation4 + $0x68] sm:$0xff] }
 0x3c6   : > { %1984 = vrcp.f32 %v1222_v53  ;;  %v1203_v33 = vld [vmem:[#allocation4 + $0x50] sm:$0xff]  ;;  %v1206_v45 = vld [vmem:[#allocation4 + $0x48] sm:$0xff]  ;;  %v1208_v13 = vld [vmem:[#allocation4 + $0x20] sm:$0xff] }
 0x3c7   : > { %1986 = vrcp.f32 %v1221_v62  ;;  %v1205_v7 = vld [vmem:[#allocation4 + $0x8] sm:$0xff]  ;;  %v1207_v20 = vld [vmem:[#allocation4 + $0x40] sm:$0xff]  ;;  %v1210_v63 = vld [vmem:[#allocation4 + $0x38] sm:$0xff] }
 0x3c8   : > { %1988 = vrcp.f32 %v1224_v40  ;;  %v1209_v55 = vld [vmem:[#allocation4 + $0x10] sm:$0xff]  ;;  %v1211_v22 = vld [vmem:[#allocation4 + $0x60] sm:$0xff] }
 0x3c9   : > { %1990 = vrcp.f32 %v1223_v51  ;;  %v1212_v12 = vld [vmem:[#allocation4 + $0x70] sm:$0xff] }
 0x3ca   : > { %1992 = vrcp.f32 %v1226_v9 }
 0x3cb   : > { %1994 = vrcp.f32 %v1225_v19 }
 0x3cc   : > { %1996 = vrcp.f32 %v1228_v11 }
 0x3cd   : > { %v1973_v1 = vpop.eup %1972  ;;  %1998 = vrcp.f32 %v1227_v41 }
 0x3ce   : > { %v1975_v23 = vpop.eup %1974  ;;  %1275 = vperm.xlu1 %1971, %v1973_v1   ;;  %2000 = vrcp.f32 %v1230_v14  ;;  %v1214_v1 = vld [vmem:[#allocation4 + $0x28] sm:$0xff] }
 0x3cf   : > { %v1977_v27 = vpop.eup %1976  ;;  %1265 = vperm.xlu0 %1970, %v1975_v23   ;;  %2002 = vrcp.f32 %v1229_v32  ;;  %v1213_v23 = vld [vmem:[#allocation4 + $0x78] sm:$0xff] }
 0x3d0   : > { %v1979_v34 = vpop.eup %1978 }
 0x3d1   : > { %v1981_v0 = vpop.eup %1980 }
 0x3d2   : > { %1280 = vperm.xlu1 %1971, %v1977_v27   ;;  %v1983_v50 = vpop.eup %1982 }
 0x3d3   : > { %1270 = vperm.xlu0 %1970, %v1979_v34   ;;  %v1985_v2 = vpop.eup %1984 }
 0x3d4   : > { %v1987_v15 = vpop.eup %1986 }
 0x3d5   : > { %v1989_v52 = vpop.eup %1988 }
 0x3d6   : > { %1290 = vperm.xlu1 %1971, %v1981_v0   ;;  %v1991_v36 = vpop.eup %1990 }
 0x3d7   : > { %1285 = vperm.xlu0 %1970, %v1983_v50   ;;  %v1993_v28 = vpop.eup %1992 }
 0x3d8   : > { %v1995_v30 = vpop.eup %1994 }
 0x3d9   : > { %v1997_v26 = vpop.eup %1996 }
 0x3da   : > { %1300 = vperm.xlu1 %1971, %v1985_v2   ;;  %v1999_v31 = vpop.eup %1998 }
 0x3db   : > { %1295 = vperm.xlu0 %1970, %v1987_v15   ;;  %v2001_v5 = vpop.eup %2000 }
 0x3dc   : > { %v2003_v54 = vpop.eup %2002 }
 0x3de   : > { %1310 = vperm.xlu1 %1971, %v1989_v52  }
 0x3df   : > { %1305 = vperm.xlu0 %1970, %v1991_v36  }
 0x3e2   : > { %1320 = vperm.xlu1 %1971, %v1993_v28  }
 0x3e3   : > { %1315 = vperm.xlu0 %1970, %v1995_v30  }
 0x3e6   : > { %1330 = vperm.xlu1 %1971, %v1997_v26  }
 0x3e7   : > { %1325 = vperm.xlu0 %1970, %v1999_v31  }
 0x3ea   : > { %1340 = vperm.xlu1 %1971, %v2001_v5  }
 0x3eb   : > { %1335 = vperm.xlu0 %1970, %v2003_v54  }
 0x449   : > { %v1276_v38 = vpop.permute.xlu1 %1275 }
 0x44a   : > { %v1345_v56 = vmul.f32 %v1276_v38, %v1201_v42  ;;  %v1266_v59 = vpop.permute.xlu0 %1265 }
 0x44b   : > { %v1343_v48 = vmul.f32 %v1266_v59, %v1199_v47 }
 0x44c   : > { %1361 = vst [vmem:[%s2595_s21 + $0x10] sm:$0xff] %v1345_v56 }
 0x44d   : > { %1359 = vst [vmem:[%s2595_s21] sm:$0xff] %v1343_v48  ;;  %v1281_v17 = vpop.permute.xlu1 %1280 }
 0x44e   : > { %v1346_v49 = vmul.f32 %v1281_v17, %v1202_v21  ;;  %v1271_v3 = vpop.permute.xlu0 %1270 }
 0x44f   : > { %v1344_v35 = vmul.f32 %v1271_v3, %v1200_v44 }
 0x450   : > { %1362 = vst [vmem:[%s2595_s21 + $0x18] sm:$0xff] %v1346_v49 }
 0x451   : > { %1360 = vst [vmem:[%s2595_s21 + $0x8] sm:$0xff] %v1344_v35  ;;  %v1291_v57 = vpop.permute.xlu1 %1290 }
 0x452   : > { %v1348_v18 = vmul.f32 %v1291_v57, %v1204_v4  ;;  %v1286_v61 = vpop.permute.xlu0 %1285 }
 0x453   : > { %v1347_v6 = vmul.f32 %v1286_v61, %v1203_v33 }
 0x454   : > { %1364 = vst [vmem:[%s2595_s21 + $0x28] sm:$0xff] %v1348_v18 }
 0x455   : > { %1363 = vst [vmem:[%s2595_s21 + $0x20] sm:$0xff] %v1347_v6  ;;  %v1301_v24 = vpop.permute.xlu1 %1300 }
 0x456   : > { %v1350_v25 = vmul.f32 %v1301_v24, %v1206_v45  ;;  %v1296_v10 = vpop.permute.xlu0 %1295 }
 0x457   : > { %v1349_v43 = vmul.f32 %v1296_v10, %v1205_v7 }
 0x458   : > { %1366 = vst [vmem:[%s2595_s21 + $0x38] sm:$0xff] %v1350_v25 }
 0x459   : > { %1365 = vst [vmem:[%s2595_s21 + $0x30] sm:$0xff] %v1349_v43  ;;  %v1311_v60 = vpop.permute.xlu1 %1310 }
 0x45a   : > { %v1352_v46 = vmul.f32 %v1311_v60, %v1208_v13  ;;  %v1306_v37 = vpop.permute.xlu0 %1305 }
 0x45b   : > { %v1351_v39 = vmul.f32 %v1306_v37, %v1207_v20 }
 0x45c   : > { %1368 = vst [vmem:[%s2595_s21 + $0x48] sm:$0xff] %v1352_v46 }
 0x45d   : > { %1367 = vst [vmem:[%s2595_s21 + $0x40] sm:$0xff] %v1351_v39  ;;  %v1321_v58 = vpop.permute.xlu1 %1320 }
 0x45e   : > { %v1354_v16 = vmul.f32 %v1321_v58, %v1210_v63  ;;  %v1316_v8 = vpop.permute.xlu0 %1315 }
 0x45f   : > { %v1353_v29 = vmul.f32 %v1316_v8, %v1209_v55 }
 0x460   : > { %1370 = vst [vmem:[%s2595_s21 + $0x58] sm:$0xff] %v1354_v16 }
 0x461   : > { %1369 = vst [vmem:[%s2595_s21 + $0x50] sm:$0xff] %v1353_v29  ;;  %v1331_v53 = vpop.permute.xlu1 %1330 }
 0x462   : > { %v1356_v62 = vmul.f32 %v1331_v53, %v1212_v12  ;;  %v1326_v40 = vpop.permute.xlu0 %1325 }
 0x463   : > { %v1355_v51 = vmul.f32 %v1326_v40, %v1211_v22 }
 0x464   : > { %1372 = vst [vmem:[%s2595_s21 + $0x68] sm:$0xff] %v1356_v62 }
 0x465   : > { %1371 = vst [vmem:[%s2595_s21 + $0x60] sm:$0xff] %v1355_v51  ;;  %v1341_v27 = vpop.permute.xlu1 %1340 }
 0x466   : > { %v1358_v9 = vmul.f32 %v1341_v27, %v1214_v1  ;;  %v1336_v34 = vpop.permute.xlu0 %1335 }
 0x467   : > { %v1357_v19 = vmul.f32 %v1336_v34, %v1213_v23 }
 0x468   : > { %1374 = vst [vmem:[%s2595_s21 + $0x78] sm:$0xff] %v1358_v9 }
 0x469   : > { %1373 = vst [vmem:[%s2595_s21 + $0x70] sm:$0xff] %v1357_v19 }
 0x46a PF: > { %s3145_s22 = sld [smem:[#allocation20_spill]]  ;;  %s1391_s6 = sshll.u32 %s2595_s21, 4  ;;  %s2971_s6 = int_to_ptr.vmem [resolvable:$true] %s1391_s6 }
 0x46b   : > { %s3146_s2 = sld [smem:[#allocation21_spill]]  ;;  %s1376_s19 = scalar_lea.sflag [#allocation7], %s2573_s15 }
 0x46c   : > { %s3147_s8 = sld [smem:[#allocation29_spill]]  ;;  %s2088_s16 = scalar_lea.vmem %s2971_s6, 2048 }
 0x46d   : > { %s3148_s29 = sld [smem:[#allocation34_spill]]  ;;  %p2089_p11 = scmp.ne.s32.totalorder %s2971_s6, %s2088_s16 }
 0x46e   : > { %s2268_s4 = smov [#allocation11]  }
 0x46f   : > { %s2092_s3 = sshll.u32 %s2268_s4, 4  ;;  %s2093_s3 = int_to_ptr.vmem [resolvable:$false] %s2092_s3 }
 0x470   : > { %s1561_s5 = sshll.u32 %s3145_s22, 4  ;;  %s2094_s21 = scalar_lea.vmem %s2093_s3, 4096 }
 0x471   : > { %s1562_s18 = sshll.u32 %s3146_s2, 5  ;;  %p2095_p4 = scmp.lt.s32.totalorder %s2971_s6, %s2093_s3 }
 0x472   : > { %s1388_s12 = sadd.s32 %s1562_s18, %s1561_s5  ;;  %p3149_p8 = scmp.ne.s32.totalorder %s3147_s8, 0 }
 0x473   : > { %s1563_s9 = sshll.u32 %s1388_s12, 7  ;;  %p2096_p7 = scmp.lt.s32.totalorder %s2094_s21, %s2088_s16 }
 0x474   : > { %s2976_s1 = scalar_lea.hbm %s3148_s29, %s1563_s9  ;;  %p2090_p10 = pnand %p2089_p11, %p3149_p8 }
 0x475   : > { %p2097_p12 = por %p2096_p7, %p2095_p4 }
 0x476   : > { %p2091_p3 = pneg %p2090_p10 }
 0x478   : > { %p2098_p1 = pnand %p2097_p12, %p2091_p3 }
 0x47a   : > { %2101 = shalt.err (!%p2098_p1)
}
 0x47b   : > { %s2102_s30 = scalar_lea.hbm %s2976_s1, 2048  ;;  %s2106_s2 = scalar_lea.hbm %s3148_s29, 8192 }
 0x47c   : > { %p2103_p6 = scmp.ne.s32.totalorder %s2976_s1, %s2102_s30  ;;  %p2107_p2 = scmp.lt.s32.totalorder %s2976_s1, %s3148_s29 }
 0x47d   : > { %p2108_p13 = scmp.lt.s32.totalorder %s2106_s2, %s2102_s30 }
 0x47e   : > { %p2104_p9 = pnand %p2103_p6, %p3149_p8 }
 0x47f   : > { %p2109_p5 = por %p2108_p13, %p2107_p2 }
 0x480   : > { %p2105_p0 = pneg %p2104_p9 }
 0x482   : > { %p2110_p11 = pnand %p2109_p5, %p2105_p0 }
 0x484   : > { %2113 = shalt.err (!%p2110_p11)
}
 0x485   : > { %s2269_s12 = smov 128   ;;  %s2270_s9 = smov 8  }
 0x486   : > { %1749 = dma.vmem_to_hbm [thread:$0]  (%p3149_p8), %s2971_s6, 2048, %s2976_s1, %s1376_s19, %s2269_s12, %s2269_s12, %s2270_s9  }
 0x487 PF: > { %s3150_s24 = sld [smem:[#allocation17_spill]]  ;;  %p1766_p10 = scmp.ge.s32.totalorder %s2256_s27, 2 }
 0x488   : > { %s3151_s11 = sld [smem:[#allocation31_spill]] }
 0x48d   : > { %s1406_s16 = sand.u32 1, %s3150_s24  }
 0x48e   : > { %p3152_p3 = scmp.ne.s32.totalorder %s3151_s11, 0  ;;  %s1407_s4 = scalar_lea.sflag [#allocation7], %s1406_s16 }
 0x490   : > { %p1762_p4 = pnand %p1766_p10, %p3152_p3 }
 0x492   : > { %p1763_p7 = pneg %p1762_p4 }
 0x494   : > { %2191 = dma.done.wait (%p1763_p7), %s1407_s4, 2048  }
 0x495   : > { %2193 = vsyncadd (%p1763_p7), %s1407_s4, 4294965248  ;;  %s22_s27 = sadd.s32 1, %s2256_s27   ;;  %s3154_s15 = sld [smem:[#allocation16_spill]] }
 0x496   : > { %p3006_p12 = scmp.ge.s32.totalorder %s22_s27, 10   ;;  %s3155_s18 = sld [smem:[#allocation18_spill]] }
 0x497   : > { %s3156_s21 = sld [smem:[#allocation22_spill]]  ;;  %s3160_s12 = smov %s2200_s13 }
 0x498   : > { %s3157_s24 = sld [smem:[#allocation23_spill]]  ;;  %s3161_s13 = smov %s2204_s14 }
 0x499   : > { %s3158_s8 = sld [smem:[#allocation28_spill]]  ;;  %s3162_s14 = smov %s2532_s23 }
 0x49a   : > { %s3159_s6 = sld [smem:[#allocation30_spill]]  ;;  %s3163_s16 = smov %s2216_s17 }
 0x49b   : > { %s3164_s17 = smov %s2500_s7  ;;  %s3165_s19 = smov %s2228_s20 }
 0x49c   : > { %s3166_s20 = smov %s2495_s10  ;;  %s3167_s22 = smov %s2248_s25 }
 0x49d   : > { %s3168_s23 = smov %s2252_s26  ;;  %21 = sbr.rel (!%p3006_p12) target bundleno = 17 (0x11), region = 109 }
 0x49f   : > { %s3169_s25 = smov %s3158_s8 }
 0x4a0   : > { %s3170_s26 = smov %s3159_s6 }
 0x4a2   :  { %1412 = vsyncpa [#allocation6], 1 }
 0x4a3   :  { %1414 = vsyncpa [#allocation6 + $0x1], 1 }
 0x4a4   :  { %1415 = vsyncpa [#allocation9], 1 }
 0x4a5   :  { %1417 = vsyncpa [#allocation9 + $0x1], 1 }
 0x4a6   :  { %1418 = vsyncpa [#allocation7], 1 }
 0x4a7   :  { %1420 = vsyncpa [#allocation7 + $0x1], 1 }

</bundles_post_ra>
